<compile_context>
chip_gen: v7x
topology: tpu7x:2x2x1
jax: 0.10.0
libtpu: 0.0.40
codegen_flags: <defaults>
</compile_context>

<pallas_src>
import functools

import jax
import jax.numpy as jnp
from jax import lax
from jax.experimental import pallas as pl
from jax.experimental.pallas import tpu as pltpu


# ---------------------------------------------------------------------------
# Kernel 1: fused forward+backward LSTM recurrence, streamed over time chunks.
# ---------------------------------------------------------------------------
def _bilstm_recurrence_kernel(gxf_ref, gxb_ref,      # [Tc, bt, 4*Hp] x-proj (+bias) per direction
                              whf_ref, whb_ref,      # [Hp, 4*Hp] recurrent weights per direction
                              yf_ref, yb_ref,        # [Tc, bt, Hp] hidden-sequence outputs
                              carry_ref,             # [4, bt, Hp] f32: hf, cf, hb, cb (persistent)
                              *, Hp, compute_dtype):
    Tc = gxf_ref.shape[0]

    # New batch tile (chunk index 0): zero the initial (h, c) for both directions.
    @pl.when(pl.program_id(1) == 0)
    def _():
        carry_ref[...] = jnp.zeros_like(carry_ref)

    # Loop-invariant recurrent weights; Mosaic keeps them resident in VMEM.
    # TODO(synk): could pin them in the MXU staging registers (matmul_push_rhs) instead.
    whf = whf_ref[...]
    whb = whb_ref[...]

    def cell(gx, h, c, whh):
        gates = gx.astype(jnp.float32) + jnp.dot(h.astype(compute_dtype), whh,
                                                 preferred_element_type=jnp.float32)
        # TODO(synk): on v6e/v7x the sigmoid/tanh could run on bf16 pre-activations for
        # a ~2x EUP speedup; kept in f32 here for a single chip-agnostic code path.
        i = jax.nn.sigmoid(gates[:, 0 * Hp:1 * Hp])
        f = jax.nn.sigmoid(gates[:, 1 * Hp:2 * Hp])
        g = jnp.tanh(gates[:, 2 * Hp:3 * Hp])
        o = jax.nn.sigmoid(gates[:, 3 * Hp:4 * Hp])
        c = f * c + i * g
        h = o * jnp.tanh(c)
        return h, c

    def step(t, carry):
        hf, cf, hb, cb = carry
        tr = Tc - 1 - t
        # Two INDEPENDENT chains (fwd & bwd): issuing both per iteration lets one
        # chain's MXU matmul overlap the other chain's sigmoid/tanh (EUP) + gate VPU.
        hf, cf = cell(gxf_ref[t], hf, cf, whf)
        hb, cb = cell(gxb_ref[tr], hb, cb, whb)
        yf_ref[t] = hf.astype(yf_ref.dtype)      # forward output at local time t
        yb_ref[tr] = hb.astype(yb_ref.dtype)     # backward output at local time tr
        return hf, cf, hb, cb

    carry = (carry_ref[0], carry_ref[1], carry_ref[2], carry_ref[3])
    hf, cf, hb, cb = lax.fori_loop(0, Tc, step, carry)
    carry_ref[0] = hf
    carry_ref[1] = cf
    carry_ref[2] = hb
    carry_ref[3] = cb


# ---------------------------------------------------------------------------
# Kernel 2: LayerNorm over the concatenated [fwd | bwd] features (lane-dense, padded).
# ---------------------------------------------------------------------------
def _layernorm_kernel(yf_ref, yb_ref, gamma_ref, beta_ref, out_ref, *, H, Hp, eps):
    yf = yf_ref[...].astype(jnp.float32)                      # [Tc, bt, Hp]
    yb = yb_ref[...].astype(jnp.float32)
    inv_n = 1.0 / (2.0 * H)
    # Padded lanes of yf/yb are EXACTLY zero (zero-padded wih/whh/bias -> gates=0 ->
    # c=0 -> h=0), so plain sums over the padded width give exact statistics.
    mean = (jnp.sum(yf, axis=-1, keepdims=True)
            + jnp.sum(yb, axis=-1, keepdims=True)) * inv_n
    df = yf - mean
    db = yb - mean
    # Centered variance: each of the 2*(Hp-H) padded lanes contributed mean^2; remove it.
    pad_fix = (2.0 * (Hp - H)) * mean * mean
    var = (jnp.sum(df * df, axis=-1, keepdims=True)
           + jnp.sum(db * db, axis=-1, keepdims=True) - pad_fix) * inv_n
    r = lax.rsqrt(var + eps)
    # Two 128-aligned, unmasked half-stores (gamma/beta are zero on padded lanes).
    out_ref[:, :, :Hp] = ((df * r) * gamma_ref[:, :Hp] + beta_ref[:, :Hp]).astype(out_ref.dtype)
    out_ref[:, :, Hp:] = ((db * r) * gamma_ref[:, Hp:] + beta_ref[:, Hp:]).astype(out_ref.dtype)
    # TODO(synk): nn.Dropout layers are identity in eval mode; no stochastic dropout here.


# ---------------------------------------------------------------------------
# Wrapper-side helpers.
# ---------------------------------------------------------------------------
def _pack_direction(w_ih, w_hh, b_ih, b_hh, D, H, Hp):
    """PyTorch (4H, D)/(4H, H) weights -> [D,4*Hp]/[Hp,4*Hp] with gate order i|f|g|o."""
    f32 = jnp.float32
    wih = jnp.zeros((D, 4 * Hp), f32)
    whh = jnp.zeros((Hp, 4 * Hp), f32)
    bias = jnp.zeros((1, 4 * Hp), f32)
    bsum = (b_ih + b_hh).astype(f32)
    for k in range(4):                                   # PyTorch gate order: i, f, g, o
        col = k * Hp
        wih = wih.at[:, col:col + H].set(w_ih[k * H:(k + 1) * H, :].T.astype(f32))
        whh = whh.at[:H, col:col + H].set(w_hh[k * H:(k + 1) * H, :].T.astype(f32))
        bias = bias.at[0, col:col + H].set(bsum[k * H:(k + 1) * H])
    # NOTE: padded rows/columns MUST stay zero -> padded hidden units remain exactly 0,
    # which the LayerNorm statistics (and the output slicing) rely on.
    return wih, whh, bias


def _vmem_capacity_bytes():
    try:
        return int(pltpu.get_tpu_info().vmem_capacity_bytes)
    except Exception:
        return 64 * 1024 * 1024            # v7x floor: safe default


def _rec_vmem_bytes(bt, tc, Hp, cs):
    gx = 2 * 2 * tc * bt * 4 * Hp * cs     # gx_f + gx_b blocks, double-buffered
    y = 2 * 2 * tc * bt * Hp * cs          # y_f + y_b blocks, double-buffered
    w = 2 * Hp * 4 * Hp * cs               # resident recurrent weights
    carry = 4 * bt * Hp * 4                # (h, c) scratch, f32
    return gx + y + w + carry


def _ln_vmem_bytes(bt, tc, Hp, cs):
    return 2 * 2 * tc * bt * Hp * cs + 2 * tc * bt * 2 * Hp * 4 + 4 * 2 * Hp * 4


def _choose_tiles(B, T, Hp, cs, vmem_budget):
    # Second-to-last block dim must be a multiple of 8 or the full batch.
    cand_bt = sorted({d for d in range(8, B + 1, 8) if B % d == 0} | {B}, reverse=True)
    # Prefer >= 2 batch tiles so the "parallel" batch axis can shard over both v7x TCs.
    two_plus = [b for b in cand_bt if B // b >= 2]
    rest = [b for b in cand_bt if B // b < 2]
    ordered_bt = two_plus + rest if two_plus else cand_bt
    # Time-chunk candidates: divisors of T (the leading block dim has no (8,128) rule);
    # cap the chunk so VMEM stays modest even for huge T.
    cand_tc = sorted({d for d in range(8, T + 1, 8) if T % d == 0} | {T}, reverse=True)
    cand_tc = [t for t in cand_tc if t <= 256] or [min(cand_tc)]

    for bt in ordered_bt:
        for tc in cand_tc:
            if _rec_vmem_bytes(bt, tc, Hp, cs) <= vmem_budget:
                return bt, tc
    return cand_bt[-1], cand_tc[-1]


def bidirectional_lstm_block(x,
                             w_ih_f, w_hh_f, b_ih_f, b_hh_f,
                             w_ih_b, w_hh_b, b_ih_b, b_hh_b,
                             ln_gamma, ln_beta, *, eps,
                             compute_dtype=jnp.float32,
                             batch_tile=None, time_chunk=None):
    """x: [B, T, D] (batch_first, like PyTorch). Returns LayerNorm(BiLSTM(x)): [B, T, 2H] f32."""
    B, T, D = x.shape
    H = w_hh_f.shape[1]
    Hp = ((H + 127) // 128) * 128          # lane-pad hidden width -> whole-vreg gate slices
    f32 = jnp.float32
    cs = jnp.dtype(compute_dtype).itemsize

    # ---- one-time parameter glue ----
    wih_f, whh_f_p, bias_f = _pack_direction(w_ih_f, w_hh_f, b_ih_f, b_hh_f, D, H, Hp)
    wih_b, whh_b_p, bias_b = _pack_direction(w_ih_b, w_hh_b, b_ih_b, b_hh_b, D, H, Hp)
    whh_f_p = whh_f_p.astype(compute_dtype)
    whh_b_p = whh_b_p.astype(compute_dtype)

    gamma_p = (jnp.zeros((1, 2 * Hp), f32)
               .at[0, :H].set(ln_gamma[:H].astype(f32))
               .at[0, Hp:Hp + H].set(ln_gamma[H:].astype(f32)))
    beta_p = (jnp.zeros((1, 2 * Hp), f32)
              .at[0, :H].set(ln_beta[:H].astype(f32))
              .at[0, Hp:Hp + H].set(ln_beta[H:].astype(f32)))

    # ---- hoisted input projections: two [T*B, D] x [D, 4*Hp] MXU GEMMs, bias folded in.
    # gx is stored in the compute dtype (bf16 on the fast path) -> halves the dominant
    # per-step HBM/VMEM load; accumulation stays f32.
    x_tm = jnp.transpose(x, (1, 0, 2)).astype(compute_dtype)            # [T, B, D]
    xf = x_tm.reshape(T * B, D)
    gx_f = (jnp.dot(xf, wih_f.astype(compute_dtype), preferred_element_type=f32)
            + bias_f).astype(compute_dtype).reshape(T, B, 4 * Hp)
    gx_b = (jnp.dot(xf, wih_b.astype(compute_dtype), preferred_element_type=f32)
            + bias_b).astype(compute_dtype).reshape(T, B, 4 * Hp)

    # ---- tile selection sized from the actual chip's VMEM ----
    vmem_cap = _vmem_capacity_bytes()
    bt, tc = _choose_tiles(B, T, Hp, cs, int(0.7 * vmem_cap))
    if batch_tile is not None:
        bt = batch_tile
    if time_chunk is not None:
        tc = time_chunk
    assert B % bt == 0 and (bt % 8 == 0 or bt == B), (B, bt)
    assert T % tc == 0, (T, tc)
    nb, nc = B // bt, T // tc
    need = max(_rec_vmem_bytes(bt, tc, Hp, cs), _ln_vmem_bytes(bt, tc, Hp, cs))
    vmem_limit = int(min(vmem_cap, max(32 << 20, need + (16 << 20))))

    # ---- pass 1: the serial recurrence (both directions fused per grid step).
    # The backward direction walks the time chunks in reverse via its index_map, so the
    # (h, c) carry in scratch flows in the correct order for both directions.
    yf, yb = pl.pallas_call(
        functools.partial(_bilstm_recurrence_kernel, Hp=Hp, compute_dtype=compute_dtype),
        out_shape=(jax.ShapeDtypeStruct((T, B, Hp), compute_dtype),
                   jax.ShapeDtypeStruct((T, B, Hp), compute_dtype)),
        grid_spec=pltpu.PrefetchScalarGridSpec(
            num_scalar_prefetch=0,
            grid=(nb, nc),                                       # batch tiles x time chunks
            in_specs=[
                pl.BlockSpec((tc, bt, 4 * Hp), lambda b, c: (c, b, 0)),           # gx fwd
                pl.BlockSpec((tc, bt, 4 * Hp), lambda b, c: (nc - 1 - c, b, 0)),  # gx bwd (rev)
                pl.BlockSpec((Hp, 4 * Hp), lambda b, c: (0, 0)),                  # whh fwd
                pl.BlockSpec((Hp, 4 * Hp), lambda b, c: (0, 0)),                  # whh bwd
            ],
            out_specs=(
                pl.BlockSpec((tc, bt, Hp), lambda b, c: (c, b, 0)),               # y fwd
                pl.BlockSpec((tc, bt, Hp), lambda b, c: (nc - 1 - c, b, 0)),      # y bwd (rev)
            ),
            scratch_shapes=[pltpu.VMEM((4, bt, Hp), jnp.float32)],                # carry
        ),
        compiler_params=pltpu.CompilerParams(
            dimension_semantics=("parallel", "arbitrary"),
            vmem_limit_bytes=vmem_limit,
        ),
    )(gx_f, gx_b, whh_f_p, whh_b_p)

    # ---- pass 2: LayerNorm over the 2H features, lane-dense padded output.
    out_tm = pl.pallas_call(
        functools.partial(_layernorm_kernel, H=H, Hp=Hp, eps=eps),
        out_shape=jax.ShapeDtypeStruct((T, B, 2 * Hp), f32),
        grid_spec=pltpu.PrefetchScalarGridSpec(
            num_scalar_prefetch=0,
            grid=(nb, nc),
            in_specs=[
                pl.BlockSpec((tc, bt, Hp), lambda b, c: (c, b, 0)),
                pl.BlockSpec((tc, bt, Hp), lambda b, c: (c, b, 0)),
                pl.BlockSpec((1, 2 * Hp), lambda b, c: (0, 0)),
                pl.BlockSpec((1, 2 * Hp), lambda b, c: (0, 0)),
            ],
            out_specs=pl.BlockSpec((tc, bt, 2 * Hp), lambda b, c: (c, b, 0)),
        ),
        compiler_params=pltpu.CompilerParams(
            dimension_semantics=("parallel", "parallel"),
            vmem_limit_bytes=vmem_limit,
        ),
    )(yf, yb, gamma_p, beta_p)

    # Strip the feature padding and return batch-major, matching the PyTorch module.
    # TODO(synk): this slice+transpose is one XLA copy; it could be folded into the LN
    # kernel's out BlockSpec (batch-major blocks) if profiling shows it matters.
    out = jnp.concatenate([out_tm[:, :, :H], out_tm[:, :, Hp:Hp + H]], axis=-1)
    return jnp.transpose(out, (1, 0, 2))                          # [B, T, 2H]


# ---------------------- pure-JAX reference for validation ----------------------
def _ref_forward(x, p, gamma, beta, eps):
    B, T, D = x.shape
    H = p["w_hh_f"].shape[1]

    def run_dir(xs, w_ih, w_hh, b_ih, b_hh):
        wih, whh, b = w_ih.T, w_hh.T, b_ih + b_hh

        def step(carry, x_t):
            h, c = carry
            g = x_t @ wih + h @ whh + b
            i = jax.nn.sigmoid(g[:, 0 * H:1 * H])
            f = jax.nn.sigmoid(g[:, 1 * H:2 * H])
            gg = jnp.tanh(g[:, 2 * H:3 * H])
            o = jax.nn.sigmoid(g[:, 3 * H:4 * H])
            c = f * c + i * gg
            h = o * jnp.tanh(c)
            return (h, c), h

        init = (jnp.zeros((B, H), jnp.float32), jnp.zeros((B, H), jnp.float32))
        _, ys = lax.scan(step, init, jnp.swapaxes(xs, 0, 1))
        return jnp.swapaxes(ys, 0, 1)

    yf = run_dir(x, p["w_ih_f"], p["w_hh_f"], p["b_ih_f"], p["b_hh_f"])
    yb = jnp.flip(run_dir(jnp.flip(x, 1), p["w_ih_b"], p["w_hh_b"], p["b_ih_b"], p["b_hh_b"]), 1)
    y = jnp.concatenate([yf, yb], axis=-1)
    mu = jnp.mean(y, axis=-1, keepdims=True)
    var = jnp.mean((y - mu) ** 2, axis=-1, keepdims=True)
    return (y - mu) * lax.rsqrt(var + eps) * gamma + beta


if __name__ == "__main__":
    eps = 1e-5
    key = jax.random.PRNGKey(0)

    def make_params(k, D, H):
        ks = jax.random.split(k, 8)
        bound = 1.0 / jnp.sqrt(jnp.float32(H))
        u = lambda kk, s: jax.random.uniform(kk, s, jnp.float32, -bound, bound)
        return dict(
            w_ih_f=u(ks[0], (4 * H, D)), w_hh_f=u(ks[1], (4 * H, H)),
            b_ih_f=u(ks[2], (4 * H,)), b_hh_f=u(ks[3], (4 * H,)),
            w_ih_b=u(ks[4], (4 * H, D)), w_hh_b=u(ks[5], (4 * H, H)),
            b_ih_b=u(ks[6], (4 * H,)), b_hh_b=u(ks[7], (4 * H,)),
        )

    def run(x, p, gamma, beta, **kw):
        return bidirectional_lstm_block(
            x, p["w_ih_f"], p["w_hh_f"], p["b_ih_f"], p["b_hh_f"],
            p["w_ih_b"], p["w_hh_b"], p["b_ih_b"], p["b_hh_b"],
            gamma, beta, eps=eps, **kw)

    # ---- config 1: module-spec shapes (batch=2, seq=8, features=16, hidden=32) ----
    B, T, D, H = 2, 8, 16, 32
    kp, kx, key = jax.random.split(key, 3)
    p = make_params(kp, D, H)
    gamma = jnp.ones((2 * H,), jnp.float32)        # nn.LayerNorm default init
    beta = jnp.zeros((2 * H,), jnp.float32)
    x = jax.random.normal(kx, (B, T, D), jnp.float32)
    ref = _ref_forward(x, p, gamma, beta, eps)

    out = jax.block_until_ready(run(x, p, gamma, beta, compute_dtype=jnp.float32))
    assert out.shape == (B, T, 2 * H), out.shape
    err = float(jnp.max(jnp.abs(out - ref)))
    assert err < 1e-3, f"f32 path error {err}"

    # bf16 matmul/gx path (MXU-native); state + LayerNorm stay f32 -> looser tolerance.
    out_bf = jax.block_until_ready(run(x, p, gamma, beta, compute_dtype=jnp.bfloat16))
    err_bf = float(jnp.max(jnp.abs(out_bf - ref)))
    assert err_bf < 1e-1, f"bf16 path error {err_bf}"

    # ---- config 2: exercise time-chunked streaming + multi batch tiles + carry flow ----
    B2, T2 = 16, 32
    kp2, kx2, kg2, kb2, key = jax.random.split(key, 5)
    p2 = make_params(kp2, D, H)
    gamma2 = 1.0 + 0.1 * jax.random.normal(kg2, (2 * H,), jnp.float32)
    beta2 = 0.1 * jax.random.normal(kb2, (2 * H,), jnp.float32)
    x2 = jax.random.normal(kx2, (B2, T2, D), jnp.float32)
    ref2 = _ref_forward(x2, p2, gamma2, beta2, eps)

    out2 = jax.block_until_ready(
        run(x2, p2, gamma2, beta2, compute_dtype=jnp.float32, batch_tile=8, time_chunk=8))
    assert out2.shape == (B2, T2, 2 * H), out2.shape
    err2 = float(jnp.max(jnp.abs(out2 - ref2)))
    assert err2 < 3e-3, f"chunked f32 path error {err2}"

    print("KERNEL_OK")
</pallas_src>

<mosaic_0001>
module attributes {stable_mosaic.version = 11 : i64} {
  func.func @_bilstm_recurrence_kernel(%arg0: i32, %arg1: i32, %arg2: memref<8x2x512xf32, #tpu.memory_space<vmem>>, %arg3: memref<8x2x512xf32, #tpu.memory_space<vmem>>, %arg4: memref<128x512xf32, #tpu.memory_space<vmem>>, %arg5: memref<128x512xf32, #tpu.memory_space<vmem>>, %arg6: memref<8x2x128xf32, #tpu.memory_space<vmem>>, %arg7: memref<8x2x128xf32, #tpu.memory_space<vmem>>, %arg8: memref<4x2x128xf32, #tpu.memory_space<vmem>>) attributes {dimension_semantics = [#tpu.dimension_semantics<parallel>, #tpu.dimension_semantics<arbitrary>], iteration_bounds = array<i64: 1, 1>, scalar_prefetch = 0 : i64, scratch_operands = 1 : i64, tpu.core_type = #tpu.core_type<tc>, window_params = [{transform_indices = @transform_0, window_bounds = array<i64: 8, 2, 512>}, {transform_indices = @transform_1, window_bounds = array<i64: 8, 2, 512>}, {pipeline_mode = #tpu.pipeline_mode<synchronous>, transform_indices = @transform_2, window_bounds = array<i64: 128, 512>}, {pipeline_mode = #tpu.pipeline_mode<synchronous>, transform_indices = @transform_3, window_bounds = array<i64: 128, 512>}, {transform_indices = @transform_4, window_bounds = array<i64: 8, 2, 128>}, {transform_indices = @transform_5, window_bounds = array<i64: 8, 2, 128>}]} {
    %c0_i32 = arith.constant 0 : i32
    %0 = arith.cmpi eq, %arg1, %c0_i32 : i32
    %1 = arith.extui %0 : i1 to i32
    %c0_i32_0 = arith.constant 0 : i32
    %2 = arith.cmpi ne, %1, %c0_i32_0 : i32
    scf.if %2 {
      %cst = arith.constant 0.000000e+00 : f32
      %27 = vector.broadcast %cst : f32 to vector<4x2x128xf32>
      %c0_27 = arith.constant 0 : index
      %c0_28 = arith.constant 0 : index
      %c0_29 = arith.constant 0 : index
      %28 = vector.load %arg8[%c0_27, %c0_28, %c0_29] : memref<4x2x128xf32, #tpu.memory_space<vmem>>, vector<4x2x128xf32>
      tpu.vector_store %arg8[%c0_27, %c0_28, %c0_29], %27 {strides = array<i32>} : memref<4x2x128xf32, #tpu.memory_space<vmem>>, vector<4x2x128xf32>,
    } else {
    }
    %c0 = arith.constant 0 : index
    %c0_1 = arith.constant 0 : index
    %3 = vector.load %arg4[%c0, %c0_1] : memref<128x512xf32, #tpu.memory_space<vmem>>, vector<128x512xf32>
    %c0_2 = arith.constant 0 : index
    %c0_3 = arith.constant 0 : index
    %4 = vector.load %arg5[%c0_2, %c0_3] : memref<128x512xf32, #tpu.memory_space<vmem>>, vector<128x512xf32>
    %c0_4 = arith.constant 0 : index
    %c0_5 = arith.constant 0 : index
    %c0_6 = arith.constant 0 : index
    %5 = vector.load %arg8[%c0_4, %c0_5, %c0_6] : memref<4x2x128xf32, #tpu.memory_space<vmem>>, vector<1x2x128xf32>
    %6 = vector.shape_cast %5 : vector<1x2x128xf32> to vector<2x128xf32>
    %c1 = arith.constant 1 : index
    %c0_7 = arith.constant 0 : index
    %c0_8 = arith.constant 0 : index
    %7 = vector.load %arg8[%c1, %c0_7, %c0_8] : memref<4x2x128xf32, #tpu.memory_space<vmem>>, vector<1x2x128xf32>
    %8 = vector.shape_cast %7 : vector<1x2x128xf32> to vector<2x128xf32>
    %c2 = arith.constant 2 : index
    %c0_9 = arith.constant 0 : index
    %c0_10 = arith.constant 0 : index
    %9 = vector.load %arg8[%c2, %c0_9, %c0_10] : memref<4x2x128xf32, #tpu.memory_space<vmem>>, vector<1x2x128xf32>
    %10 = vector.shape_cast %9 : vector<1x2x128xf32> to vector<2x128xf32>
    %c3 = arith.constant 3 : index
    %c0_11 = arith.constant 0 : index
    %c0_12 = arith.constant 0 : index
    %11 = vector.load %arg8[%c3, %c0_11, %c0_12] : memref<4x2x128xf32, #tpu.memory_space<vmem>>, vector<1x2x128xf32>
    %12 = vector.shape_cast %11 : vector<1x2x128xf32> to vector<2x128xf32>
    %c0_i32_13 = arith.constant 0 : i32
    %c8_i32 = arith.constant 8 : i32
    %13 = arith.addi %c0_i32_13, %c8_i32 : i32
    %c1_i32 = arith.constant 1 : i32
    %14:4 = scf.for %arg9 = %c0_i32_13 to %13 step %c1_i32 iter_args(%arg10 = %6, %arg11 = %8, %arg12 = %10, %arg13 = %12) -> (vector<2x128xf32>, vector<2x128xf32>, vector<2x128xf32>, vector<2x128xf32>)  : i32 {
      %c7_i32 = arith.constant 7 : i32
      %27 = arith.subi %c7_i32, %arg9 : i32
      %28 = arith.index_cast %arg9 : i32 to index
      %c0_27 = arith.constant 0 : index
      %c0_28 = arith.constant 0 : index
      %29 = vector.load %arg2[%28, %c0_27, %c0_28] : memref<8x2x512xf32, #tpu.memory_space<vmem>>, vector<1x2x512xf32>
      %30 = vector.shape_cast %29 : vector<1x2x512xf32> to vector<2x512xf32>
      %cst = arith.constant dense<0.000000e+00> : vector<2x512xf32>
      %31 = tpu.matmul %arg10, %3, %cst {dimension_numbers = #tpu.dot_dimension_numbers<[1], [0], [0], [1], [0, 0, 1, 1], [], []>} : vector<2x128xf32>, vector<128x512xf32>, vector<2x512xf32> -> vector<2x512xf32>
      %32 = arith.addf %30, %31 : vector<2x512xf32>
      %33 = vector.extract_strided_slice %32 {offsets = [0, 0], sizes = [2, 128], strides = [1, 1]} : vector<2x512xf32> to vector<2x128xf32>
      %34 = arith.negf %33 : vector<2x128xf32>
      %35 = math.exp %34 : vector<2x128xf32>
      %cst_29 = arith.constant 1.000000e+00 : f32
      %36 = vector.broadcast %cst_29 : f32 to vector<2x128xf32>
      %37 = arith.addf %36, %35 : vector<2x128xf32>
      %38 = arith.divf %36, %37 : vector<2x128xf32>
      %39 = vector.extract_strided_slice %32 {offsets = [0, 128], sizes = [2, 128], strides = [1, 1]} : vector<2x512xf32> to vector<2x128xf32>
      %40 = arith.negf %39 : vector<2x128xf32>
      %41 = math.exp %40 : vector<2x128xf32>
      %cst_30 = arith.constant 1.000000e+00 : f32
      %42 = vector.broadcast %cst_30 : f32 to vector<2x128xf32>
      %43 = arith.addf %42, %41 : vector<2x128xf32>
      %44 = arith.divf %42, %43 : vector<2x128xf32>
      %45 = vector.extract_strided_slice %32 {offsets = [0, 256], sizes = [2, 128], strides = [1, 1]} : vector<2x512xf32> to vector<2x128xf32>
      %46 = math.tanh %45 : vector<2x128xf32>
      %47 = vector.extract_strided_slice %32 {offsets = [0, 384], sizes = [2, 128], strides = [1, 1]} : vector<2x512xf32> to vector<2x128xf32>
      %48 = arith.negf %47 : vector<2x128xf32>
      %49 = math.exp %48 : vector<2x128xf32>
      %cst_31 = arith.constant 1.000000e+00 : f32
      %50 = vector.broadcast %cst_31 : f32 to vector<2x128xf32>
      %51 = arith.addf %50, %49 : vector<2x128xf32>
      %52 = arith.divf %50, %51 : vector<2x128xf32>
      %53 = arith.mulf %44, %arg11 : vector<2x128xf32>
      %54 = arith.mulf %38, %46 : vector<2x128xf32>
      %55 = arith.addf %53, %54 : vector<2x128xf32>
      %56 = math.tanh %55 : vector<2x128xf32>
      %57 = arith.mulf %52, %56 : vector<2x128xf32>
      %58 = arith.index_cast %27 : i32 to index
      %c0_32 = arith.constant 0 : index
      %c0_33 = arith.constant 0 : index
      %59 = vector.load %arg3[%58, %c0_32, %c0_33] : memref<8x2x512xf32, #tpu.memory_space<vmem>>, vector<1x2x512xf32>
      %60 = vector.shape_cast %59 : vector<1x2x512xf32> to vector<2x512xf32>
      %cst_34 = arith.constant dense<0.000000e+00> : vector<2x512xf32>
      %61 = tpu.matmul %arg12, %4, %cst_34 {dimension_numbers = #tpu.dot_dimension_numbers<[1], [0], [0], [1], [0, 0, 1, 1], [], []>} : vector<2x128xf32>, vector<128x512xf32>, vector<2x512xf32> -> vector<2x512xf32>
      %62 = arith.addf %60, %61 : vector<2x512xf32>
      %63 = vector.extract_strided_slice %62 {offsets = [0, 0], sizes = [2, 128], strides = [1, 1]} : vector<2x512xf32> to vector<2x128xf32>
      %64 = arith.negf %63 : vector<2x128xf32>
      %65 = math.exp %64 : vector<2x128xf32>
      %cst_35 = arith.constant 1.000000e+00 : f32
      %66 = vector.broadcast %cst_35 : f32 to vector<2x128xf32>
      %67 = arith.addf %66, %65 : vector<2x128xf32>
      %68 = arith.divf %66, %67 : vector<2x128xf32>
      %69 = vector.extract_strided_slice %62 {offsets = [0, 128], sizes = [2, 128], strides = [1, 1]} : vector<2x512xf32> to vector<2x128xf32>
      %70 = arith.negf %69 : vector<2x128xf32>
      %71 = math.exp %70 : vector<2x128xf32>
      %cst_36 = arith.constant 1.000000e+00 : f32
      %72 = vector.broadcast %cst_36 : f32 to vector<2x128xf32>
      %73 = arith.addf %72, %71 : vector<2x128xf32>
      %74 = arith.divf %72, %73 : vector<2x128xf32>
      %75 = vector.extract_strided_slice %62 {offsets = [0, 256], sizes = [2, 128], strides = [1, 1]} : vector<2x512xf32> to vector<2x128xf32>
      %76 = math.tanh %75 : vector<2x128xf32>
      %77 = vector.extract_strided_slice %62 {offsets = [0, 384], sizes = [2, 128], strides = [1, 1]} : vector<2x512xf32> to vector<2x128xf32>
      %78 = arith.negf %77 : vector<2x128xf32>
      %79 = math.exp %78 : vector<2x128xf32>
      %cst_37 = arith.constant 1.000000e+00 : f32
      %80 = vector.broadcast %cst_37 : f32 to vector<2x128xf32>
      %81 = arith.addf %80, %79 : vector<2x128xf32>
      %82 = arith.divf %80, %81 : vector<2x128xf32>
      %83 = arith.mulf %74, %arg13 : vector<2x128xf32>
      %84 = arith.mulf %68, %76 : vector<2x128xf32>
      %85 = arith.addf %83, %84 : vector<2x128xf32>
      %86 = math.tanh %85 : vector<2x128xf32>
      %87 = arith.mulf %82, %86 : vector<2x128xf32>
      %88 = arith.index_cast %arg9 : i32 to index
      %c0_38 = arith.constant 0 : index
      %c0_39 = arith.constant 0 : index
      %89 = vector.load %arg6[%88, %c0_38, %c0_39] : memref<8x2x128xf32, #tpu.memory_space<vmem>>, vector<1x2x128xf32>
      %90 = vector.shape_cast %89 : vector<1x2x128xf32> to vector<2x128xf32>
      %91 = vector.shape_cast %57 : vector<2x128xf32> to vector<1x2x128xf32>
      tpu.vector_store %arg6[%88, %c0_38, %c0_39], %91 {strides = array<i32>} : memref<8x2x128xf32, #tpu.memory_space<vmem>>, vector<1x2x128xf32>,
      %92 = arith.index_cast %27 : i32 to index
      %c0_40 = arith.constant 0 : index
      %c0_41 = arith.constant 0 : index
      %93 = vector.load %arg7[%92, %c0_40, %c0_41] : memref<8x2x128xf32, #tpu.memory_space<vmem>>, vector<1x2x128xf32>
      %94 = vector.shape_cast %93 : vector<1x2x128xf32> to vector<2x128xf32>
      %95 = vector.shape_cast %87 : vector<2x128xf32> to vector<1x2x128xf32>
      tpu.vector_store %arg7[%92, %c0_40, %c0_41], %95 {strides = array<i32>} : memref<8x2x128xf32, #tpu.memory_space<vmem>>, vector<1x2x128xf32>,
      scf.yield %57, %55, %87, %85 : vector<2x128xf32>, vector<2x128xf32>, vector<2x128xf32>, vector<2x128xf32>
    }
    %c8_i32_14 = arith.constant 8 : i32
    %c0_15 = arith.constant 0 : index
    %c0_16 = arith.constant 0 : index
    %c0_17 = arith.constant 0 : index
    %15 = vector.load %arg8[%c0_15, %c0_16, %c0_17] : memref<4x2x128xf32, #tpu.memory_space<vmem>>, vector<1x2x128xf32>
    %16 = vector.shape_cast %15 : vector<1x2x128xf32> to vector<2x128xf32>
    %17 = vector.shape_cast %14#0 : vector<2x128xf32> to vector<1x2x128xf32>
    tpu.vector_store %arg8[%c0_15, %c0_16, %c0_17], %17 {strides = array<i32>} : memref<4x2x128xf32, #tpu.memory_space<vmem>>, vector<1x2x128xf32>,
    %c1_18 = arith.constant 1 : index
    %c0_19 = arith.constant 0 : index
    %c0_20 = arith.constant 0 : index
    %18 = vector.load %arg8[%c1_18, %c0_19, %c0_20] : memref<4x2x128xf32, #tpu.memory_space<vmem>>, vector<1x2x128xf32>
    %19 = vector.shape_cast %18 : vector<1x2x128xf32> to vector<2x128xf32>
    %20 = vector.shape_cast %14#1 : vector<2x128xf32> to vector<1x2x128xf32>
    tpu.vector_store %arg8[%c1_18, %c0_19, %c0_20], %20 {strides = array<i32>} : memref<4x2x128xf32, #tpu.memory_space<vmem>>, vector<1x2x128xf32>,
    %c2_21 = arith.constant 2 : index
    %c0_22 = arith.constant 0 : index
    %c0_23 = arith.constant 0 : index
    %21 = vector.load %arg8[%c2_21, %c0_22, %c0_23] : memref<4x2x128xf32, #tpu.memory_space<vmem>>, vector<1x2x128xf32>
    %22 = vector.shape_cast %21 : vector<1x2x128xf32> to vector<2x128xf32>
    %23 = vector.shape_cast %14#2 : vector<2x128xf32> to vector<1x2x128xf32>
    tpu.vector_store %arg8[%c2_21, %c0_22, %c0_23], %23 {strides = array<i32>} : memref<4x2x128xf32, #tpu.memory_space<vmem>>, vector<1x2x128xf32>,
    %c3_24 = arith.constant 3 : index
    %c0_25 = arith.constant 0 : index
    %c0_26 = arith.constant 0 : index
    %24 = vector.load %arg8[%c3_24, %c0_25, %c0_26] : memref<4x2x128xf32, #tpu.memory_space<vmem>>, vector<1x2x128xf32>
    %25 = vector.shape_cast %24 : vector<1x2x128xf32> to vector<2x128xf32>
    %26 = vector.shape_cast %14#3 : vector<2x128xf32> to vector<1x2x128xf32>
    tpu.vector_store %arg8[%c3_24, %c0_25, %c0_26], %26 {strides = array<i32>} : memref<4x2x128xf32, #tpu.memory_space<vmem>>, vector<1x2x128xf32>,
    return
  }
  func.func @transform_0(%arg0: i32, %arg1: i32) -> (i32, i32, i32) {
    %c0_i32 = arith.constant 0 : i32
    %c0_i32_0 = arith.constant 0 : i32
    return %arg1, %arg0, %c0_i32 : i32, i32, i32
  }
  func.func @transform_1(%arg0: i32, %arg1: i32) -> (i32, i32, i32) {
    %c0_i32 = arith.constant 0 : i32
    %0 = arith.subi %c0_i32, %arg1 : i32
    %c0_i32_0 = arith.constant 0 : i32
    %c0_i32_1 = arith.constant 0 : i32
    return %0, %arg0, %c0_i32_0 : i32, i32, i32
  }
  func.func @transform_2(%arg0: i32, %arg1: i32) -> (i32, i32) {
    %c0_i32 = arith.constant 0 : i32
    %c0_i32_0 = arith.constant 0 : i32
    %c0_i32_1 = arith.constant 0 : i32
    return %c0_i32, %c0_i32_0 : i32, i32
  }
  func.func @transform_3(%arg0: i32, %arg1: i32) -> (i32, i32) {
    %c0_i32 = arith.constant 0 : i32
    %c0_i32_0 = arith.constant 0 : i32
    %c0_i32_1 = arith.constant 0 : i32
    return %c0_i32, %c0_i32_0 : i32, i32
  }
  func.func @transform_4(%arg0: i32, %arg1: i32) -> (i32, i32, i32) {
    %c0_i32 = arith.constant 0 : i32
    %c0_i32_0 = arith.constant 0 : i32
    return %arg1, %arg0, %c0_i32 : i32, i32, i32
  }
  func.func @transform_5(%arg0: i32, %arg1: i32) -> (i32, i32, i32) {
    %c0_i32 = arith.constant 0 : i32
    %0 = arith.subi %c0_i32, %arg1 : i32
    %c0_i32_0 = arith.constant 0 : i32
    %c0_i32_1 = arith.constant 0 : i32
    return %0, %arg0, %c0_i32_0 : i32, i32, i32
  }
}

</mosaic_0001>

<bundles_post_ra>
// kernel: tpu_custom_call.1
= control target key start
LH: loop header
LB: loop body
LE: loop exit
PB: predicated region body
PF: predicated region fallthrough
CT: control target
= control target key end

     0   :  { %11 = vsyncpa [#allocation4], 0  ;;  %s1693_s0 = inlined_call_operand.hbm [shape: f32[8,2,512], index: 0, kind: input, shape index: {}]   ;;  %s1694_s1 = inlined_call_operand.hbm [shape: f32[8,2,512], index: 1, kind: input, shape index: {}]   ;;  %s1695_s2 = inlined_call_operand.hbm [shape: f32[128,512], index: 2, kind: input, shape index: {}]   ;;  %s1696_s3 = inlined_call_operand.hbm [shape: f32[128,512], index: 3, kind: input, shape index: {}]   ;;  %s1697_s4 = inlined_call_operand.hbm [shape: f32[8,2,128], index: 4, kind: output, shape index: {0}]   ;;  %s1698_s5 = inlined_call_operand.hbm [shape: f32[8,2,128], index: 5, kind: output, shape index: {1}]  }
   0x1   :  { %12 = vsyncpa [#allocation7], 0 }
   0x2   :  { %13 = vsyncpa [#allocation10], 0 }
   0x3   :  { %14 = vsyncpa [#allocation5], 0 }
   0x4   :  { %15 = vsyncpa [#allocation13], 0  ;;  %s1127_s18 = smov [#allocation6]   ;;  %s1128_s20 = smov [#allocation3]  }
   0x5   :  { %s38_s19 = sshll.u32 %s1127_s18, 4  ;;  %s21_s21 = sshll.u32 %s1128_s20, 4  ;;  %s39_s19 = int_to_ptr.vmem [resolvable:$true] %s38_s19  ;;  %s1171_s21 = int_to_ptr.vmem [resolvable:$true] %s21_s21 }
   0x6   :  { %s945_s24 = scalar_lea.hbm %s1694_s1, 1024 }
   0x7   :  { %p946_p0 = scmp.ne.s32.totalorder %s1694_s1, %s945_s24  ;;  %p949_p1 = scmp.lt.u32.totalorder %s945_s24, %s1694_s1 }
   0x9   :  { %p951_p2 = pnand %p949_p1, %p946_p0 }
   0xb   :  { %954 = shalt.err (!%p951_p2)
}
   0xc   :  { %s955_s29 = scalar_lea.vmem %s39_s19, 1024  ;;  %p960_p4 = scmp.lt.s32.totalorder %s39_s19, %s39_s19 }
   0xd   :  { %p956_p3 = scmp.ne.s32.totalorder %s39_s19, %s955_s29  ;;  %p961_p5 = scmp.lt.s32.totalorder %s955_s29, %s955_s29 }
   0xf   :  { %p962_p6 = por %p961_p5, %p960_p4 }
  0x11   :  { %p963_p7 = pnand %p962_p6, %p956_p3 }
  0x13   :  { %966 = shalt.err (!%p963_p7)
}
  0x14   :  { %s1129_s30 = smov 128   ;;  %s1130_s6 = smov 8  }
  0x15   :  { %44 = dma.hbm_to_vmem [thread:$0]  %s1694_s1, 1024, %s39_s19, [#allocation7], %s1129_s30, %s1129_s30, %s1130_s6  }
  0x16   :  { %s967_s11 = scalar_lea.hbm %s1693_s0, 1024 }
  0x17   :  { %p968_p8 = scmp.ne.s32.totalorder %s1693_s0, %s967_s11  ;;  %p971_p9 = scmp.lt.u32.totalorder %s967_s11, %s1693_s0 }
  0x19   :  { %p973_p10 = pnand %p971_p9, %p968_p8 }
  0x1b   :  { %976 = shalt.err (!%p973_p10)
}
  0x1c   :  { %s977_s16 = scalar_lea.vmem %s1171_s21, 1024  ;;  %p982_p12 = scmp.lt.s32.totalorder %s1171_s21, %s1171_s21 }
  0x1d   :  { %p978_p11 = scmp.ne.s32.totalorder %s1171_s21, %s977_s16  ;;  %p983_p13 = scmp.lt.s32.totalorder %s977_s16, %s977_s16 }
  0x1f   :  { %p984_p0 = por %p983_p13, %p982_p12 }
  0x21   :  { %p985_p1 = pnand %p984_p0, %p978_p11 }
  0x23   :  { %988 = shalt.err (!%p985_p1)
}
  0x24   :  { %27 = dma.hbm_to_vmem [thread:$0]  %s1693_s0, 1024, %s1171_s21, [#allocation4], %s1129_s30, %s1129_s30, %s1130_s6  }
  0x25   :  { %s1131_s18 = smov [#allocation8]   ;;  %s989_s23 = scalar_lea.hbm %s1695_s2, 8192 }
  0x26   :  { %s50_s19 = sshll.u32 %s1131_s18, 4  ;;  %p990_p2 = scmp.ne.s32.totalorder %s1695_s2, %s989_s23  ;;  %s51_s19 = int_to_ptr.vmem [resolvable:$true] %s50_s19 }
  0x27   :  { %p993_p3 = scmp.lt.u32.totalorder %s989_s23, %s1695_s2 }
  0x29   :  { %p995_p4 = pnand %p993_p3, %p990_p2 }
  0x2b   :  { %998 = shalt.err (!%p995_p4)
}
  0x2c   :  { %s999_s28 = scalar_lea.vmem %s51_s19, 8192  ;;  %p1004_p6 = scmp.lt.s32.totalorder %s51_s19, %s51_s19 }
  0x2d   :  { %p1000_p5 = scmp.ne.s32.totalorder %s51_s19, %s999_s28  ;;  %p1005_p7 = scmp.lt.s32.totalorder %s999_s28, %s999_s28 }
  0x2f   :  { %p1006_p8 = por %p1005_p7, %p1004_p6 }
  0x31   :  { %p1007_p9 = pnand %p1006_p8, %p1000_p5 }
  0x33   :  { %1010 = shalt.err (!%p1007_p9)
}
  0x34   :  { %s1132_s0 = smov 512   ;;  %s1133_s21 = smov 32  }
  0x35   :  { %56 = dma.hbm_to_vmem [thread:$0]  %s1695_s2, 8192, %s51_s19, [#allocation7], %s1132_s0, %s1132_s0, %s1133_s21  }
  0x36   :  { %s1134_s6 = smov [#allocation9]   ;;  %s1011_s10 = scalar_lea.hbm %s1696_s3, 8192 }
  0x37   :  { %s62_s7 = sshll.u32 %s1134_s6, 4  ;;  %p1012_p10 = scmp.ne.s32.totalorder %s1696_s3, %s1011_s10  ;;  %s63_s7 = int_to_ptr.vmem [resolvable:$true] %s62_s7 }
  0x38   :  { %p1015_p11 = scmp.lt.u32.totalorder %s1011_s10, %s1696_s3 }
  0x3a   :  { %p1017_p12 = pnand %p1015_p11, %p1012_p10 }
  0x3c   :  { %1020 = shalt.err (!%p1017_p12)
}
  0x3d   :  { %s1021_s15 = scalar_lea.vmem %s63_s7, 8192  ;;  %p1026_p0 = scmp.lt.s32.totalorder %s63_s7, %s63_s7 }
  0x3e   :  { %p1022_p13 = scmp.ne.s32.totalorder %s63_s7, %s1021_s15  ;;  %p1027_p1 = scmp.lt.s32.totalorder %s1021_s15, %s1021_s15 }
  0x40   :  { %p1028_p2 = por %p1027_p1, %p1026_p0 }
  0x42   :  { %p1029_p3 = pnand %p1028_p2, %p1022_p13 }
  0x44   :  { %1032 = shalt.err (!%p1029_p3)
}
  0x45   :  { %68 = dma.hbm_to_vmem [thread:$0]  %s1696_s3, 8192, %s63_s7, [#allocation10], %s1132_s0, %s1132_s0, %s1133_s21  }
  0x46   :  { %1097 = dma.done.wait [#allocation4], 1024  }
  0x47   :  { %1098 = vsyncadd [#allocation4], 4294966272 }
  0x48   :  { %1099 = dma.done.wait [#allocation7], 9216  }
  0x49   :  { %1100 = vsyncadd [#allocation7], 4294958080 }
  0x4a   :  { %1101 = dma.done.wait [#allocation10], 8192  }
  0x4b   :  { %1102 = vsyncadd [#allocation10], 4294959104  ;;  %v1135_v0 = vmov 0.0   ;;  %v1228_v1 = vld [vmem:[#allocation8] sm:$0xff]  ;;  %v1230_v2 = vld [vmem:[#allocation8 + $0x8] sm:$0xff]  ;;  %s1492_s3 = smov 0  }
  0x4c   :  { %89 = vst [vmem:[#allocation2] sm:$0x3] %v1135_v0  ;;  %90 = vst [vmem:[#allocation2 + $0x2] sm:$0x3] %v1135_v0  ;;  %v1232_v3 = vld [vmem:[#allocation8 + $0x10] sm:$0xff]  ;;  %v1234_v4 = vld [vmem:[#allocation8 + $0x18] sm:$0xff] }
  0x4d   :  { %91 = vst [vmem:[#allocation2 + $0x4] sm:$0x3] %v1135_v0  ;;  %92 = vst [vmem:[#allocation2 + $0x6] sm:$0x3] %v1135_v0  ;;  %v1236_v5 = vld [vmem:[#allocation8 + $0x20] sm:$0xff]  ;;  %v1238_v6 = vld [vmem:[#allocation8 + $0x28] sm:$0xff] }
  0x4e   :  { %1702 = vst [vmem:[#allocation19_spill] sm:$0xff] %v1228_v1  ;;  %1703 = vst [vmem:[#allocation20_spill] sm:$0xff] %v1230_v2  ;;  %v1240_v7 = vld [vmem:[#allocation8 + $0x30] sm:$0xff]  ;;  %v1242_v8 = vld [vmem:[#allocation8 + $0x38] sm:$0xff] }
  0x4f   :  { %1704 = vst [vmem:[#allocation21_spill] sm:$0xff] %v1232_v3  ;;  %1705 = vst [vmem:[#allocation22_spill] sm:$0xff] %v1234_v4  ;;  %v1244_v9 = vld [vmem:[#allocation8 + $0x40] sm:$0xff]  ;;  %v1246_v10 = vld [vmem:[#allocation8 + $0x48] sm:$0xff] }
  0x50   :  { %1706 = vst [vmem:[#allocation23_spill] sm:$0xff] %v1236_v5  ;;  %1707 = vst [vmem:[#allocation24_spill] sm:$0xff] %v1238_v6  ;;  %v1248_v11 = vld [vmem:[#allocation8 + $0x50] sm:$0xff]  ;;  %v1250_v12 = vld [vmem:[#allocation8 + $0x58] sm:$0xff] }
  0x51   :  { %1708 = vst [vmem:[#allocation25_spill] sm:$0xff] %v1240_v7  ;;  %1709 = vst [vmem:[#allocation26_spill] sm:$0xff] %v1242_v8  ;;  %v1252_v13 = vld [vmem:[#allocation8 + $0x60] sm:$0xff]  ;;  %v1254_v14 = vld [vmem:[#allocation8 + $0x68] sm:$0xff] }
  0x52   :  { %1710 = vst [vmem:[#allocation27_spill] sm:$0xff] %v1244_v9  ;;  %1711 = vst [vmem:[#allocation28_spill] sm:$0xff] %v1246_v10  ;;  %v1256_v15 = vld [vmem:[#allocation8 + $0x70] sm:$0xff]  ;;  %v1258_v16 = vld [vmem:[#allocation8 + $0x78] sm:$0xff] }
  0x53   :  { %1712 = vst [vmem:[#allocation29_spill] sm:$0xff] %v1248_v11  ;;  %1713 = vst [vmem:[#allocation30_spill] sm:$0xff] %v1250_v12  ;;  %v1260_v17 = vld [vmem:[#allocation8 + $0x80] sm:$0xff]  ;;  %v1262_v18 = vld [vmem:[#allocation8 + $0x88] sm:$0xff] }
  0x54   :  { %1714 = vst [vmem:[#allocation31_spill] sm:$0xff] %v1252_v13  ;;  %1715 = vst [vmem:[#allocation32_spill] sm:$0xff] %v1254_v14  ;;  %v1264_v19 = vld [vmem:[#allocation8 + $0x90] sm:$0xff]  ;;  %v1266_v20 = vld [vmem:[#allocation8 + $0x98] sm:$0xff] }
  0x55   :  { %1716 = vst [vmem:[#allocation33_spill] sm:$0xff] %v1256_v15  ;;  %1717 = vst [vmem:[#allocation34_spill] sm:$0xff] %v1258_v16  ;;  %v1268_v21 = vld [vmem:[#allocation8 + $0xa0] sm:$0xff]  ;;  %v1270_v22 = vld [vmem:[#allocation8 + $0xa8] sm:$0xff] }
  0x56   :  { %v1272_v23 = vld [vmem:[#allocation8 + $0xb0] sm:$0xff]  ;;  %v1274_v24 = vld [vmem:[#allocation8 + $0xb8] sm:$0xff]  ;;  %v1276_v25 = vld [vmem:[#allocation8 + $0xc0] sm:$0xff] }
  0x57   :  { %v1278_v26 = vld [vmem:[#allocation8 + $0xc8] sm:$0xff]  ;;  %v1280_v27 = vld [vmem:[#allocation8 + $0xd0] sm:$0xff]  ;;  %v1282_v28 = vld [vmem:[#allocation8 + $0xd8] sm:$0xff] }
  0x58   :  { %v1284_v29 = vld [vmem:[#allocation8 + $0xe0] sm:$0xff]  ;;  %v1286_v30 = vld [vmem:[#allocation8 + $0xe8] sm:$0xff]  ;;  %v1288_v31 = vld [vmem:[#allocation8 + $0xf0] sm:$0xff] }
  0x59   :  { %v1290_v32 = vld [vmem:[#allocation8 + $0xf8] sm:$0xff]  ;;  %v1292_v33 = vld [vmem:[#allocation8 + $0x100] sm:$0xff]  ;;  %v1294_v34 = vld [vmem:[#allocation8 + $0x108] sm:$0xff] }
  0x5a   :  { %v1296_v35 = vld [vmem:[#allocation8 + $0x110] sm:$0xff]  ;;  %v1298_v36 = vld [vmem:[#allocation8 + $0x118] sm:$0xff]  ;;  %v1300_v37 = vld [vmem:[#allocation8 + $0x120] sm:$0xff] }
  0x5b   :  { %v1302_v38 = vld [vmem:[#allocation8 + $0x128] sm:$0xff]  ;;  %v1304_v39 = vld [vmem:[#allocation8 + $0x130] sm:$0xff]  ;;  %v1306_v40 = vld [vmem:[#allocation8 + $0x138] sm:$0xff] }
  0x5c   :  { %v1308_v41 = vld [vmem:[#allocation8 + $0x140] sm:$0xff]  ;;  %v1310_v42 = vld [vmem:[#allocation8 + $0x148] sm:$0xff]  ;;  %v1312_v43 = vld [vmem:[#allocation8 + $0x150] sm:$0xff] }
  0x5d   :  { %v1314_v44 = vld [vmem:[#allocation8 + $0x158] sm:$0xff]  ;;  %v1316_v45 = vld [vmem:[#allocation8 + $0x160] sm:$0xff]  ;;  %v1318_v46 = vld [vmem:[#allocation8 + $0x168] sm:$0xff] }
  0x5e   :  { %v1320_v47 = vld [vmem:[#allocation8 + $0x170] sm:$0xff]  ;;  %v1322_v48 = vld [vmem:[#allocation8 + $0x178] sm:$0xff]  ;;  %v1324_v49 = vld [vmem:[#allocation8 + $0x180] sm:$0xff] }
  0x5f   :  { %1718 = vst [vmem:[#allocation35_spill] sm:$0xff] %v1324_v49  ;;  %v1326_v50 = vld [vmem:[#allocation8 + $0x188] sm:$0xff]  ;;  %v1328_v51 = vld [vmem:[#allocation8 + $0x190] sm:$0xff]  ;;  %v1330_v52 = vld [vmem:[#allocation8 + $0x198] sm:$0xff] }
  0x60   :  { %1719 = vst [vmem:[#allocation36_spill] sm:$0xff] %v1328_v51  ;;  %v1332_v53 = vld [vmem:[#allocation8 + $0x1a0] sm:$0xff]  ;;  %v1334_v54 = vld [vmem:[#allocation8 + $0x1a8] sm:$0xff]  ;;  %v1336_v55 = vld [vmem:[#allocation8 + $0x1b0] sm:$0xff] }
  0x61   :  { %1720 = vst [vmem:[#allocation37_spill] sm:$0xff] %v1332_v53  ;;  %1721 = vst [vmem:[#allocation38_spill] sm:$0xff] %v1336_v55  ;;  %v1338_v56 = vld [vmem:[#allocation8 + $0x1b8] sm:$0xff]  ;;  %v1340_v57 = vld [vmem:[#allocation8 + $0x1c0] sm:$0xff] }
  0x62   :  { %1722 = vst [vmem:[#allocation39_spill] sm:$0xff] %v1340_v57  ;;  %v1342_v58 = vld [vmem:[#allocation8 + $0x1c8] sm:$0xff]  ;;  %v1344_v59 = vld [vmem:[#allocation8 + $0x1d0] sm:$0xff]  ;;  %v1346_v60 = vld [vmem:[#allocation8 + $0x1d8] sm:$0xff] }
  0x63   :  { %1723 = vst [vmem:[#allocation40_spill] sm:$0xff] %v1342_v58  ;;  %1724 = vst [vmem:[#allocation41_spill] sm:$0xff] %v1344_v59  ;;  %v1348_v61 = vld [vmem:[#allocation8 + $0x1e0] sm:$0xff]  ;;  %v1350_v62 = vld [vmem:[#allocation8 + $0x1e8] sm:$0xff] }
  0x64   :  { %1725 = vst [vmem:[#allocation42_spill] sm:$0xff] %v1346_v60  ;;  %1726 = vst [vmem:[#allocation43_spill] sm:$0xff] %v1348_v61  ;;  %v1352_v63 = vld [vmem:[#allocation8 + $0x1f0] sm:$0xff]  ;;  %v1354_v0 = vld [vmem:[#allocation8 + $0x1f8] sm:$0xff] }
  0x65   :  { %1727 = vst [vmem:[#allocation44_spill] sm:$0xff] %v1350_v62  ;;  %1728 = vst [vmem:[#allocation45_spill] sm:$0xff] %v1352_v63  ;;  %v1356_v51 = vld [vmem:[#allocation9] sm:$0xff]  ;;  %v1358_v55 = vld [vmem:[#allocation9 + $0x8] sm:$0xff] }
  0x66   :  { %1729 = vst [vmem:[#allocation46_spill] sm:$0xff] %v1354_v0  ;;  %1730 = vst [vmem:[#allocation47_spill] sm:$0xff] %v1356_v51  ;;  %v1360_v53 = vld [vmem:[#allocation9 + $0x10] sm:$0xff]  ;;  %v1362_v57 = vld [vmem:[#allocation9 + $0x18] sm:$0xff] }
  0x67   :  { %1731 = vst [vmem:[#allocation48_spill] sm:$0xff] %v1358_v55  ;;  %1732 = vst [vmem:[#allocation49_spill] sm:$0xff] %v1360_v53  ;;  %v1364_v58 = vld [vmem:[#allocation9 + $0x20] sm:$0xff]  ;;  %v1366_v59 = vld [vmem:[#allocation9 + $0x28] sm:$0xff] }
  0x68   :  { %1733 = vst [vmem:[#allocation50_spill] sm:$0xff] %v1362_v57  ;;  %1734 = vst [vmem:[#allocation51_spill] sm:$0xff] %v1364_v58  ;;  %v1368_v60 = vld [vmem:[#allocation9 + $0x30] sm:$0xff]  ;;  %v1370_v61 = vld [vmem:[#allocation9 + $0x38] sm:$0xff] }
  0x69   :  { %1735 = vst [vmem:[#allocation52_spill] sm:$0xff] %v1366_v59  ;;  %1736 = vst [vmem:[#allocation53_spill] sm:$0xff] %v1368_v60  ;;  %v1372_v62 = vld [vmem:[#allocation9 + $0x40] sm:$0xff]  ;;  %v1374_v63 = vld [vmem:[#allocation9 + $0x48] sm:$0xff] }
  0x6a   :  { %1737 = vst [vmem:[#allocation54_spill] sm:$0xff] %v1370_v61  ;;  %1738 = vst [vmem:[#allocation55_spill] sm:$0xff] %v1372_v62  ;;  %v1376_v0 = vld [vmem:[#allocation9 + $0x50] sm:$0xff]  ;;  %v1378_v51 = vld [vmem:[#allocation9 + $0x58] sm:$0xff] }
  0x6b   :  { %1739 = vst [vmem:[#allocation56_spill] sm:$0xff] %v1374_v63  ;;  %1740 = vst [vmem:[#allocation57_spill] sm:$0xff] %v1376_v0  ;;  %v1380_v55 = vld [vmem:[#allocation9 + $0x60] sm:$0xff]  ;;  %v1382_v53 = vld [vmem:[#allocation9 + $0x68] sm:$0xff] }
  0x6c   :  { %1741 = vst [vmem:[#allocation58_spill] sm:$0xff] %v1378_v51  ;;  %1742 = vst [vmem:[#allocation59_spill] sm:$0xff] %v1380_v55  ;;  %v1384_v57 = vld [vmem:[#allocation9 + $0x70] sm:$0xff]  ;;  %v1386_v58 = vld [vmem:[#allocation9 + $0x78] sm:$0xff] }
  0x6d   :  { %1743 = vst [vmem:[#allocation60_spill] sm:$0xff] %v1382_v53  ;;  %1744 = vst [vmem:[#allocation61_spill] sm:$0xff] %v1384_v57  ;;  %v1388_v59 = vld [vmem:[#allocation9 + $0x80] sm:$0xff]  ;;  %v1390_v60 = vld [vmem:[#allocation9 + $0x88] sm:$0xff] }
  0x6e   :  { %1745 = vst [vmem:[#allocation62_spill] sm:$0xff] %v1386_v58  ;;  %1746 = vst [vmem:[#allocation63_spill] sm:$0xff] %v1388_v59  ;;  %v1392_v61 = vld [vmem:[#allocation9 + $0x90] sm:$0xff]  ;;  %v1394_v62 = vld [vmem:[#allocation9 + $0x98] sm:$0xff] }
  0x6f   :  { %1747 = vst [vmem:[#allocation64_spill] sm:$0xff] %v1390_v60  ;;  %1748 = vst [vmem:[#allocation65_spill] sm:$0xff] %v1392_v61  ;;  %v1396_v63 = vld [vmem:[#allocation9 + $0xa0] sm:$0xff]  ;;  %v1398_v0 = vld [vmem:[#allocation9 + $0xa8] sm:$0xff] }
  0x70   :  { %1749 = vst [vmem:[#allocation66_spill] sm:$0xff] %v1394_v62  ;;  %1750 = vst [vmem:[#allocation67_spill] sm:$0xff] %v1396_v63  ;;  %v1400_v51 = vld [vmem:[#allocation9 + $0xb0] sm:$0xff]  ;;  %v1402_v55 = vld [vmem:[#allocation9 + $0xb8] sm:$0xff] }
  0x71   :  { %1751 = vst [vmem:[#allocation68_spill] sm:$0xff] %v1398_v0  ;;  %1752 = vst [vmem:[#allocation69_spill] sm:$0xff] %v1400_v51  ;;  %v1404_v53 = vld [vmem:[#allocation9 + $0xc0] sm:$0xff]  ;;  %v1406_v57 = vld [vmem:[#allocation9 + $0xc8] sm:$0xff] }
  0x72   :  { %1753 = vst [vmem:[#allocation70_spill] sm:$0xff] %v1402_v55  ;;  %1754 = vst [vmem:[#allocation71_spill] sm:$0xff] %v1404_v53  ;;  %v1408_v58 = vld [vmem:[#allocation9 + $0xd0] sm:$0xff]  ;;  %v1410_v59 = vld [vmem:[#allocation9 + $0xd8] sm:$0xff] }
  0x73   :  { %1755 = vst [vmem:[#allocation72_spill] sm:$0xff] %v1406_v57  ;;  %1756 = vst [vmem:[#allocation73_spill] sm:$0xff] %v1408_v58  ;;  %v1412_v60 = vld [vmem:[#allocation9 + $0xe0] sm:$0xff]  ;;  %v1414_v61 = vld [vmem:[#allocation9 + $0xe8] sm:$0xff] }
  0x74   :  { %1757 = vst [vmem:[#allocation74_spill] sm:$0xff] %v1410_v59  ;;  %1758 = vst [vmem:[#allocation75_spill] sm:$0xff] %v1412_v60  ;;  %v1416_v62 = vld [vmem:[#allocation9 + $0xf0] sm:$0xff]  ;;  %v1418_v63 = vld [vmem:[#allocation9 + $0xf8] sm:$0xff] }
  0x75   :  { %1759 = vst [vmem:[#allocation76_spill] sm:$0xff] %v1414_v61  ;;  %1760 = vst [vmem:[#allocation77_spill] sm:$0xff] %v1416_v62  ;;  %v1420_v0 = vld [vmem:[#allocation9 + $0x100] sm:$0xff]  ;;  %v1422_v51 = vld [vmem:[#allocation9 + $0x108] sm:$0xff] }
  0x76   :  { %1761 = vst [vmem:[#allocation78_spill] sm:$0xff] %v1418_v63  ;;  %1762 = vst [vmem:[#allocation79_spill] sm:$0xff] %v1420_v0  ;;  %v1424_v55 = vld [vmem:[#allocation9 + $0x110] sm:$0xff]  ;;  %v1426_v53 = vld [vmem:[#allocation9 + $0x118] sm:$0xff] }
  0x77   :  { %1763 = vst [vmem:[#allocation80_spill] sm:$0xff] %v1422_v51  ;;  %1764 = vst [vmem:[#allocation81_spill] sm:$0xff] %v1424_v55  ;;  %v1428_v57 = vld [vmem:[#allocation9 + $0x120] sm:$0xff]  ;;  %v1430_v58 = vld [vmem:[#allocation9 + $0x128] sm:$0xff] }
  0x78   :  { %1765 = vst [vmem:[#allocation82_spill] sm:$0xff] %v1426_v53  ;;  %1766 = vst [vmem:[#allocation83_spill] sm:$0xff] %v1428_v57  ;;  %v1432_v59 = vld [vmem:[#allocation9 + $0x130] sm:$0xff]  ;;  %v1434_v60 = vld [vmem:[#allocation9 + $0x138] sm:$0xff] }
  0x79   :  { %1767 = vst [vmem:[#allocation84_spill] sm:$0xff] %v1430_v58  ;;  %1768 = vst [vmem:[#allocation85_spill] sm:$0xff] %v1432_v59  ;;  %v1436_v61 = vld [vmem:[#allocation9 + $0x140] sm:$0xff]  ;;  %v1438_v62 = vld [vmem:[#allocation9 + $0x148] sm:$0xff] }
  0x7a   :  { %1769 = vst [vmem:[#allocation86_spill] sm:$0xff] %v1434_v60  ;;  %1770 = vst [vmem:[#allocation87_spill] sm:$0xff] %v1436_v61  ;;  %v1440_v63 = vld [vmem:[#allocation9 + $0x150] sm:$0xff]  ;;  %v1442_v0 = vld [vmem:[#allocation9 + $0x158] sm:$0xff] }
  0x7b   :  { %1771 = vst [vmem:[#allocation88_spill] sm:$0xff] %v1438_v62  ;;  %1772 = vst [vmem:[#allocation89_spill] sm:$0xff] %v1440_v63  ;;  %v1444_v51 = vld [vmem:[#allocation9 + $0x160] sm:$0xff]  ;;  %v1446_v55 = vld [vmem:[#allocation9 + $0x168] sm:$0xff] }
  0x7c   :  { %1773 = vst [vmem:[#allocation90_spill] sm:$0xff] %v1442_v0  ;;  %1774 = vst [vmem:[#allocation91_spill] sm:$0xff] %v1444_v51  ;;  %v1448_v53 = vld [vmem:[#allocation9 + $0x170] sm:$0xff]  ;;  %v1450_v57 = vld [vmem:[#allocation9 + $0x178] sm:$0xff] }
  0x7d   :  { %1775 = vst [vmem:[#allocation92_spill] sm:$0xff] %v1446_v55  ;;  %1776 = vst [vmem:[#allocation93_spill] sm:$0xff] %v1448_v53  ;;  %v1452_v58 = vld [vmem:[#allocation9 + $0x180] sm:$0xff]  ;;  %v1454_v59 = vld [vmem:[#allocation9 + $0x188] sm:$0xff] }
  0x7e   :  { %1777 = vst [vmem:[#allocation94_spill] sm:$0xff] %v1450_v57  ;;  %1778 = vst [vmem:[#allocation95_spill] sm:$0xff] %v1452_v58  ;;  %v1456_v60 = vld [vmem:[#allocation9 + $0x190] sm:$0xff]  ;;  %v1458_v61 = vld [vmem:[#allocation9 + $0x198] sm:$0xff] }
  0x7f   :  { %1779 = vst [vmem:[#allocation96_spill] sm:$0xff] %v1454_v59  ;;  %1780 = vst [vmem:[#allocation97_spill] sm:$0xff] %v1456_v60  ;;  %v1460_v62 = vld [vmem:[#allocation9 + $0x1a0] sm:$0xff]  ;;  %v1462_v63 = vld [vmem:[#allocation9 + $0x1a8] sm:$0xff] }
  0x80   :  { %1781 = vst [vmem:[#allocation98_spill] sm:$0xff] %v1458_v61  ;;  %1782 = vst [vmem:[#allocation99_spill] sm:$0xff] %v1460_v62  ;;  %v1464_v0 = vld [vmem:[#allocation9 + $0x1b0] sm:$0xff]  ;;  %v1466_v51 = vld [vmem:[#allocation9 + $0x1b8] sm:$0xff] }
  0x81   :  { %1783 = vst [vmem:[#allocation100_spill] sm:$0xff] %v1462_v63  ;;  %1784 = vst [vmem:[#allocation101_spill] sm:$0xff] %v1464_v0  ;;  %v1468_v55 = vld [vmem:[#allocation9 + $0x1c0] sm:$0xff]  ;;  %v1470_v53 = vld [vmem:[#allocation9 + $0x1c8] sm:$0xff] }
  0x82   :  { %1785 = vst [vmem:[#allocation102_spill] sm:$0xff] %v1466_v51  ;;  %v1472_v57 = vld [vmem:[#allocation9 + $0x1d0] sm:$0xff]  ;;  %v1474_v58 = vld [vmem:[#allocation9 + $0x1d8] sm:$0xff]  ;;  %v1476_v59 = vld [vmem:[#allocation9 + $0x1e0] sm:$0xff] }
  0x83   :  { %1786 = vst [vmem:[#allocation103_spill] sm:$0xff] %v1472_v57  ;;  %1787 = vst [vmem:[#allocation104_spill] sm:$0xff] %v1476_v59  ;;  %v1478_v60 = vld [vmem:[#allocation9 + $0x1e8] sm:$0xff]  ;;  %v1480_v61 = vld [vmem:[#allocation9 + $0x1f0] sm:$0xff] }
  0x84   :  { %1788 = vst [vmem:[#allocation105_spill] sm:$0xff] %v1480_v61  ;;  %v1482_v62 = vld [vmem:[#allocation9 + $0x1f8] sm:$0xff] }
  0x85   :  { %v221_v63 = vld [vmem:[#allocation2] sm:$0x3]   ;;  %v223_v0 = vld [vmem:[#allocation2 + $0x2] sm:$0x3]   ;;  %v225_v49 = vld [vmem:[#allocation2 + $0x4] sm:$0x3]  }
  0x86   :  { %v227_v51 = vld [vmem:[#allocation2 + $0x6] sm:$0x3]  }
  0x87 LB: > { %1789 = vst [vmem:[#allocation106_spill] sm:$0xff] %v1109_v51  ;;  %1790 = vst [vmem:[#allocation107_spill] sm:$0xff] %v1113_v49  ;;  %v1792_v2 = vld [vmem:[#allocation20_spill] sm:$0xff]  ;;  %v1794_v4 = vld [vmem:[#allocation22_spill] sm:$0xff]  ;;  %s729_s1 = sshll.u32 %s1125_s3, 3  ;;  %s238_s18 = ssub.s32 7, %s1125_s3  ;;  %s1125_s3 = sphi %s1492_s3, %s233_s3   ;;  %v1121_v63 = vphi %v221_v63, %v1886_v63   ;;  %v1117_v0 = vphi %v223_v0, %v1885_v0   ;;  %v1113_v49 = vphi %v225_v49, %v1884_v49   ;;  %v1109_v51 = vphi %v227_v51, %v1883_v51  }
  0x88   : > { %1791 = vst [vmem:[#allocation108_spill] sm:$0xff] %v1117_v0  ;;  %v1793_v6 = vld [vmem:[#allocation24_spill] sm:$0xff]  ;;  %v1795_v8 = vld [vmem:[#allocation26_spill] sm:$0xff]  ;;  %v1796_v1 = vld [vmem:[#allocation19_spill] sm:$0xff]  ;;  %s241_s17 = scalar_lea.vmem [#allocation3], %s729_s1  ;;  %s730_s19 = sshll.u32 %s238_s18, 3 }
  0x89   : > { %v731_v61 = vpack.c.bf16 %v1793_v6, %v1792_v2  ;;  %v763_v57 = vpack.c.bf16 %v1795_v8, %v1794_v4  ;;  %v1797_v5 = vld [vmem:[#allocation23_spill] sm:$0xff]  ;;  %v1798_v3 = vld [vmem:[#allocation21_spill] sm:$0xff]  ;;  %v1800_v10 = vld [vmem:[#allocation28_spill] sm:$0xff]  ;;  %s441_s20 = scalar_lea.vmem [#allocation6], %s730_s19  ;;  %s727_s22 = sshll.u32 %s1125_s3, 1 }
  0x8a   : > { %v733_v51 = vpack.c.bf16 %v1797_v5, %v1796_v1  ;;  %v1799_v7 = vld [vmem:[#allocation25_spill] sm:$0xff]  ;;  %v1801_v14 = vld [vmem:[#allocation32_spill] sm:$0xff]  ;;  %v1802_v12 = vld [vmem:[#allocation30_spill] sm:$0xff]  ;;  %v739_v1 = vpack.c.bf16 %v1270_v22, %v1262_v18  ;;  %v1700_v5 = vmov 0.0   ;;  %s640_s23 = scalar_lea.vmem [#allocation11], %s727_s22  ;;  %s728_s24 = sshll.u32 %s238_s18, 1 }
  0x8b   : > { %v765_v49 = vpack.c.bf16 %v1799_v7, %v1798_v3  ;;  %v735_v0 = vpack.c.bf16 %v1801_v14, %v1800_v10  ;;  %v1803_v16 = vld [vmem:[#allocation34_spill] sm:$0xff]  ;;  %732 = vmatprep.subr.bf16.mxu0 %v731_v61  ;;  %764 = vmatprep.subr.bf16.mxu1 %v763_v57  ;;  %v1804_v9 = vld [vmem:[#allocation27_spill] sm:$0xff]  ;;  %v1806_v11 = vld [vmem:[#allocation29_spill] sm:$0xff]  ;;  %v771_v3 = vpack.c.bf16 %v1274_v24, %v1266_v20  ;;  %s643_s25 = scalar_lea.vmem [#allocation12], %s728_s24  ;;  %s233_s3 = sadd.s32 1, %s1125_s3  }
  0x8c   : > { %v767_v59 = vpack.c.bf16 %v1803_v16, %v1802_v12  ;;  %734 = vmatpush1.bf16.msra.mxu0 %v733_v51  ;;  %v1805_v13 = vld [vmem:[#allocation31_spill] sm:$0xff]  ;;  %v1807_v15 = vld [vmem:[#allocation33_spill] sm:$0xff]  ;;  %307 = vmatprep.mubr.f32.mxu0 %v1700_v5  ;;  %v773_v51 = vpack.c.bf16 %v1272_v23, %v1264_v19  ;;  %v743_v57 = vpack.c.bf16 %v1286_v30, %v1278_v26  ;;  %v1812_v7 = vld [vmem:[#allocation40_spill] sm:$0xff]  ;;  %p230_p4 = scmp.ge.s32.totalorder %s233_s3, 8  }
  0x8d   : > { %766 = vmatpush1.bf16.msra.mxu1 %v765_v49  ;;  %v737_v2 = vpack.c.bf16 %v1805_v13, %v1804_v9  ;;  %v769_v4 = vpack.c.bf16 %v1807_v15, %v1806_v11  ;;  %736 = vmatprep.subr.bf16.mxu0 %v735_v0  ;;  %v741_v49 = vpack.c.bf16 %v1268_v21, %v1260_v17  ;;  %v1813_v8 = vld [vmem:[#allocation44_spill] sm:$0xff]  ;;  %v1815_v9 = vld [vmem:[#allocation46_spill] sm:$0xff]  ;;  %v1816_v11 = vld [vmem:[#allocation39_spill] sm:$0xff]  ;;  %s1138_s26 = smov (%p230_p4), [#allocation11]   ;;  %s1139_s28 = smov (%p230_p4), [#allocation12]  }
  0x8e   : > { %768 = vmatprep.subr.bf16.mxu1 %v767_v59  ;;  %378 = vmatprep.mubr.f32.mxu1 %v1700_v5  ;;  %v775_v59 = vpack.c.bf16 %v1290_v32, %v1282_v28  ;;  %v749_v61 = vpack.c.bf16 %v1300_v37, %v1292_v33  ;;  %v781_v0 = vpack.c.bf16 %v1304_v39, %v1296_v35  ;;  %v1811_v5 = vld [vmem:[#allocation38_spill] sm:$0xff]  ;;  %v1817_v12 = vld [vmem:[#allocation43_spill] sm:$0xff]  ;;  %v1819_v13 = vld [vmem:[#allocation45_spill] sm:$0xff]  ;;  %s654_s27 = sshll.u32 (%p230_p4), %s1138_s26, 4  ;;  %s670_s0 = sshll.u32 (%p230_p4), %s1139_s28, 4  ;;  %s655_s27 = int_to_ptr.vmem [resolvable:$true] %s654_s27  ;;  %s671_s0 = int_to_ptr.vmem [resolvable:$true] %s670_s0 }
  0x8f   :  { %s1033_s29 = scalar_lea.vmem (%p230_p4), %s655_s27, 256  ;;  %p1038_p6 = scmp.lt.s32.totalorder (%p230_p4), %s655_s27, %s655_s27 }
  0x90   : > { %738 = vmatpush1.bf16.msra.mxu0 %v737_v2  ;;  %v745_v2 = vpack.c.bf16 %v1284_v29, %v1276_v25  ;;  %p1034_p5 = scmp.ne.s32.totalorder (%p230_p4), %s655_s27, %s1033_s29  ;;  %p1039_p7 = scmp.lt.s32.totalorder (%p230_p4), %s1033_s29, %s1033_s29 }
  0x91   : > { %770 = vmatpush1.bf16.msra.mxu1 %v769_v4  ;;  %740 = vmatprep.subr.bf16.mxu0 %v739_v1  ;;  %v777_v4 = vpack.c.bf16 %v1288_v31, %v1280_v27  ;;  %v747_v1 = vpack.c.bf16 %v1302_v38, %v1294_v34 }
  0x92   : > { %772 = vmatprep.subr.bf16.mxu1 %v771_v3  ;;  %v779_v3 = vpack.c.bf16 %v1306_v40, %v1298_v36  ;;  %p1040_p8 = por (%p230_p4), %p1039_p7, %p1038_p6 }
  0x94   : > { %742 = vmatpush1.bf16.msra.mxu0 %v741_v49  ;;  %v751_v49 = vpack.c.bf16 %v1318_v46, %v1310_v42  ;;  %p1041_p9 = pnand (%p230_p4), %p1040_p8, %p1034_p5 }
  0x95   : > { %774 = vmatpush1.bf16.msra.mxu1 %v773_v51  ;;  %744 = vmatprep.subr.bf16.mxu0 %v743_v57  ;;  %v783_v51 = vpack.c.bf16 %v1322_v48, %v1314_v44  ;;  %v753_v57 = vpack.c.bf16 %v1316_v45, %v1308_v41 }
  0x96   : > { %776 = vmatprep.subr.bf16.mxu1 %v775_v59  ;;  %v785_v59 = vpack.c.bf16 %v1320_v47, %v1312_v43 }
  0x98   : > { %746 = vmatpush1.bf16.msra.mxu0 %v745_v2  ;;  %v755_v2 = vpack.c.bf16 %v1334_v54, %v1326_v50 }
  0x99   : > { %778 = vmatpush1.bf16.msra.mxu1 %v777_v4  ;;  %748 = vmatprep.subr.bf16.mxu0 %v747_v1  ;;  %v787_v4 = vpack.c.bf16 %v1338_v56, %v1330_v52  ;;  %v1808_v1 = vld [vmem:[#allocation35_spill] sm:$0xff] }
  0x9a   : > { %780 = vmatprep.subr.bf16.mxu1 %v779_v3  ;;  %v1809_v3 = vld [vmem:[#allocation37_spill] sm:$0xff] }
  0x9c   : > { %750 = vmatpush1.bf16.msra.mxu0 %v749_v61  ;;  %v757_v61 = vpack.c.bf16 %v1809_v3, %v1808_v1  ;;  %v1820_v1 = vld [vmem:[#allocation48_spill] sm:$0xff]  ;;  %v1823_v3 = vld [vmem:[#allocation54_spill] sm:$0xff] }
  0x9d   : > { %782 = vmatpush1.bf16.msra.mxu1 %v781_v0  ;;  %752 = vmatprep.subr.bf16.mxu0 %v751_v49  ;;  %v1810_v0 = vld [vmem:[#allocation36_spill] sm:$0xff]  ;;  %v759_v49 = vpack.c.bf16 %v1813_v8, %v1812_v7  ;;  %v1824_v7 = vld [vmem:[#allocation47_spill] sm:$0xff] }
  0x9e   : > { %784 = vmatprep.subr.bf16.mxu1 %v783_v51  ;;  %v789_v6 = vpack.c.bf16 %v1811_v5, %v1810_v0  ;;  %v1814_v51 = vld [vmem:[#allocation42_spill] sm:$0xff]  ;;  %v1821_v5 = vld [vmem:[#allocation52_spill] sm:$0xff]  ;;  %v1825_v8 = vld [vmem:[#allocation51_spill] sm:$0xff] }
  0x9f   : > { %v791_v10 = vpack.c.bf16 %v1815_v9, %v1814_v51  ;;  %v797_v9 = vpack.c.bf16 %v1825_v8, %v1824_v7  ;;  %v1838_v8 = vld [vmem:[#allocation66_spill] sm:$0xff] }
  0xa0   : > { %754 = vmatpush1.bf16.msra.mxu0 %v753_v57  ;;  %v761_v57 = vpack.c.bf16 %v1817_v12, %v1816_v11  ;;  %v1828_v11 = vld [vmem:[#allocation56_spill] sm:$0xff] }
  0xa1   : > { %786 = vmatpush1.bf16.msra.mxu1 %v785_v59  ;;  %756 = vmatprep.subr.bf16.mxu0 %v755_v2  ;;  %v1818_v59 = vld [vmem:[#allocation41_spill] sm:$0xff]  ;;  %v795_v2 = vpack.c.bf16 %v1821_v5, %v1820_v1  ;;  %v1829_v12 = vld [vmem:[#allocation60_spill] sm:$0xff] }
  0xa2   : > { %788 = vmatprep.subr.bf16.mxu1 %v787_v4  ;;  %v793_v14 = vpack.c.bf16 %v1819_v13, %v1818_v59  ;;  %v1822_v4 = vld [vmem:[#allocation50_spill] sm:$0xff]  ;;  %v799_v13 = vpack.c.bf16 %v1829_v12, %v1828_v11  ;;  %v1834_v5 = vld [vmem:[#allocation57_spill] sm:$0xff]  ;;  %v1840_v11 = vmov 0.0  }
  0xa3   : > { %v827_v0 = vpack.c.bf16 %v1823_v3, %v1822_v4  ;;  %v1835_v4 = vld [vmem:[#allocation61_spill] sm:$0xff] }
  0xa4   : > { %758 = vmatpush1.bf16.msra.mxu0 %v757_v61  ;;  %v1827_v61 = vld [vmem:[#allocation53_spill] sm:$0xff]  ;;  %v833_v3 = vpack.c.bf16 %v1835_v4, %v1834_v5  ;;  %v1848_v5 = vld [vmem:[#allocation78_spill] sm:$0xff] }
  0xa5   : > { %790 = vmatpush1.bf16.msra.mxu1 %v789_v6  ;;  %760 = vmatprep.subr.bf16.mxu0 %v759_v49  ;;  %v1826_v6 = vld [vmem:[#allocation49_spill] sm:$0xff]  ;;  %v1831_v49 = vld [vmem:[#allocation62_spill] sm:$0xff] }
  0xa6   : > { %792 = vmatprep.subr.bf16.mxu1 %v791_v10  ;;  %v829_v51 = vpack.c.bf16 %v1827_v61, %v1826_v6  ;;  %v1830_v10 = vld [vmem:[#allocation58_spill] sm:$0xff]  ;;  %v1843_v12 = vld [vmem:[#allocation65_spill] sm:$0xff] }
  0xa7   : > { %v831_v59 = vpack.c.bf16 %v1831_v49, %v1830_v10  ;;  %v1839_v6 = vld [vmem:[#allocation70_spill] sm:$0xff]  ;;  %v1844_v10 = vld [vmem:[#allocation69_spill] sm:$0xff] }
  0xa8   : > { %762 = vmatpush1.bf16.msra.mxu0 %v761_v57  ;;  %v1833_v57 = vld [vmem:[#allocation59_spill] sm:$0xff]  ;;  %v835_v61 = vpack.c.bf16 %v1839_v6, %v1838_v8  ;;  %v837_v49 = vpack.c.bf16 %v1844_v10, %v1843_v12  ;;  %v1852_v8 = vld [vmem:[#allocation77_spill] sm:$0xff] }
  0xa9   : > { %794 = vmatpush1.bf16.msra.mxu1 %v793_v14  ;;  %796 = vmatprep.subr.bf16.mxu0 %v795_v2  ;;  %v1832_v14 = vld [vmem:[#allocation55_spill] sm:$0xff]  ;;  %v1836_v2 = vld [vmem:[#allocation64_spill] sm:$0xff] }
  0xaa   : > { %828 = vmatprep.subr.bf16.mxu1 %v827_v0  ;;  %v801_v1 = vpack.c.bf16 %v1833_v57, %v1832_v14  ;;  %v1837_v0 = vld [vmem:[#allocation68_spill] sm:$0xff]  ;;  %v1847_v57 = vld [vmem:[#allocation74_spill] sm:$0xff]  ;;  %v1857_v10 = vld [vmem:[#allocation79_spill] sm:$0xff] }
  0xab   : > { %308 = vmatmul.mubr.f32.vlgmr.msra.gmra.mrb[0].mxu0 %v1121_v63  ;;  %v803_v7 = vpack.c.bf16 %v1837_v0, %v1836_v2  ;;  %v839_v4 = vpack.c.bf16 %v1848_v5, %v1847_v57  ;;  %v1849_v2 = vld [vmem:[#allocation71_spill] sm:$0xff]  ;;  %v1861_v5 = vld [vmem:[#allocation88_spill] sm:$0xff] }
  0xac   : > { %379 = vmatmul.mubr.f32.vlgmr.msra.gmra.mrb[0].mxu1 %v1121_v63  ;;  %798 = vmatpush1.bf16.msra.mxu0 %v797_v9  ;;  %v1841_v63 = vld [vmem:[#allocation63_spill] sm:$0xff] }
  0xad   : > { %830 = vmatpush1.bf16.msra.mxu1 %v829_v51  ;;  %800 = vmatprep.subr.bf16.mxu0 %v799_v13  ;;  %v1842_v9 = vld [vmem:[#allocation67_spill] sm:$0xff]  ;;  %v1845_v13 = vld [vmem:[#allocation72_spill] sm:$0xff] }
  0xae   : > { %832 = vmatprep.subr.bf16.mxu1 %v831_v59  ;;  %507 = vmatprep.mubr.f32.mxu0 %v1840_v11  ;;  %v805_v51 = vpack.c.bf16 %v1842_v9, %v1841_v63  ;;  %v1846_v59 = vld [vmem:[#allocation76_spill] sm:$0xff]  ;;  %v1850_v0 = vld [vmem:[#allocation75_spill] sm:$0xff]  ;;  %v1856_v9 = vld [vmem:[#allocation86_spill] sm:$0xff] }
  0xaf   : > { %578 = vmatprep.mubr.f32.mxu1 %v1840_v11  ;;  %v807_v14 = vpack.c.bf16 %v1846_v59, %v1845_v13  ;;  %v1853_v11 = vld [vmem:[#allocation80_spill] sm:$0xff]  ;;  %v1858_v13 = vld [vmem:[#allocation83_spill] sm:$0xff]  ;;  %v1860_v59 = vld [vmem:[#allocation85_spill] sm:$0xff] }
  0xb0   : > { %802 = vmatpush1.bf16.msra.mxu0 %v801_v1  ;;  %v809_v1 = vpack.c.bf16 %v1850_v0, %v1849_v2  ;;  %v1854_v63 = vld [vmem:[#allocation84_spill] sm:$0xff]  ;;  %v1864_v0 = vld [vmem:[#allocation94_spill] sm:$0xff] }
  0xb1   : > { %834 = vmatpush1.bf16.msra.mxu1 %v833_v3  ;;  %804 = vmatprep.subr.bf16.mxu0 %v803_v7  ;;  %v1851_v3 = vld [vmem:[#allocation73_spill] sm:$0xff]  ;;  %v811_v7 = vpack.c.bf16 %v1854_v63, %v1853_v11  ;;  %v1862_v2 = vld [vmem:[#allocation92_spill] sm:$0xff]  ;;  %v1866_v11 = vld [vmem:[#allocation91_spill] sm:$0xff] }
  0xb2   : > { %836 = vmatprep.subr.bf16.mxu1 %v835_v61  ;;  %v841_v6 = vpack.c.bf16 %v1852_v8, %v1851_v3  ;;  %v1855_v61 = vld [vmem:[#allocation82_spill] sm:$0xff]  ;;  %v1865_v8 = vld [vmem:[#allocation87_spill] sm:$0xff]  ;;  %v1868_v63 = vld [vmem:[#allocation93_spill] sm:$0xff] }
  0xb3   : > { %v843_v12 = vpack.c.bf16 %v1856_v9, %v1855_v61  ;;  %v1869_v9 = vld [vmem:[#allocation96_spill] sm:$0xff] }
  0xb4   : > { %806 = vmatpush1.bf16.msra.mxu0 %v805_v51  ;;  %v813_v51 = vpack.c.bf16 %v1858_v13, %v1857_v10  ;;  %v1870_v10 = vld [vmem:[#allocation100_spill] sm:$0xff]  ;;  %v1872_v13 = vld [vmem:[#allocation102_spill] sm:$0xff] }
  0xb5   : > { %838 = vmatpush1.bf16.msra.mxu1 %v837_v49  ;;  %808 = vmatprep.subr.bf16.mxu0 %v807_v14  ;;  %v1859_v49 = vld [vmem:[#allocation81_spill] sm:$0xff]  ;;  %v815_v14 = vpack.c.bf16 %v1862_v2, %v1861_v5  ;;  %v1874_v5 = vld [vmem:[#allocation99_spill] sm:$0xff] }
  0xb6   : > { %840 = vmatprep.subr.bf16.mxu1 %v839_v4  ;;  %v845_v57 = vpack.c.bf16 %v1860_v59, %v1859_v49  ;;  %v1863_v4 = vld [vmem:[#allocation90_spill] sm:$0xff]  ;;  %v1873_v59 = vld [vmem:[#allocation95_spill] sm:$0xff]  ;;  %v1876_v2 = vld [vmem:[#allocation101_spill] sm:$0xff] }
  0xb7   : > { %v847_v3 = vpack.c.bf16 %v1864_v0, %v1863_v4  ;;  %v855_v0 = vpack.c.bf16 %v1482_v62, %v1474_v58 }
  0xb8   : > { %810 = vmatpush1.bf16.msra.mxu0 %v809_v1  ;;  %v817_v1 = vpack.c.bf16 %v1866_v11, %v1865_v8  ;;  %v1878_v11 = vld [vmem:[#allocation103_spill] sm:$0xff] }
  0xb9   : > { %842 = vmatpush1.bf16.msra.mxu1 %v841_v6  ;;  %812 = vmatprep.subr.bf16.mxu0 %v811_v7  ;;  %v1867_v6 = vld [vmem:[#allocation89_spill] sm:$0xff]  ;;  %v819_v7 = vpack.c.bf16 %v1870_v10, %v1869_v9  ;;  %v394_v10 = vlaneseq }
  0xba   : > { %844 = vmatprep.subr.bf16.mxu1 %v843_v12  ;;  %v849_v61 = vpack.c.bf16 %v1868_v63, %v1867_v6  ;;  %v1871_v12 = vld [vmem:[#allocation98_spill] sm:$0xff]  ;;  %v1880_v63 = vld [vmem:[#allocation107_spill] sm:$0xff] }
  0xbb   : > { %v851_v49 = vpack.c.bf16 %v1872_v13, %v1871_v12  ;;  %v395_v12 = vshrl.u32 %v394_v10, 7 }
  0xbc   : > { %814 = vmatpush1.bf16.msra.mxu0 %v813_v51  ;;  %v821_v51 = vpack.c.bf16 %v1874_v5, %v1873_v59 }
  0xbd   : > { %846 = vmatpush1.bf16.msra.mxu1 %v845_v57  ;;  %816 = vmatprep.subr.bf16.mxu0 %v815_v14  ;;  %v1875_v57 = vld [vmem:[#allocation97_spill] sm:$0xff]  ;;  %v823_v14 = vpack.c.bf16 %v1478_v60, %v1470_v53 }
  0xbe   : > { %848 = vmatprep.subr.bf16.mxu1 %v847_v3  ;;  %v853_v4 = vpack.c.bf16 %v1876_v2, %v1875_v57  ;;  %v1877_v3 = vld [vmem:[#allocation104_spill] sm:$0xff] }
  0xbf   : > { %v825_v8 = vpack.c.bf16 %v1877_v3, %v1468_v55 }
  0xc0   : > { %818 = vmatpush1.bf16.msra.mxu0 %v817_v1  ;;  %v1879_v1 = vld [vmem:[#allocation105_spill] sm:$0xff] }
  0xc1   : > { %850 = vmatpush1.bf16.msra.mxu1 %v849_v61  ;;  %820 = vmatprep.subr.bf16.mxu0 %v819_v7  ;;  %v857_v6 = vpack.c.bf16 %v1879_v1, %v1878_v11  ;;  %v1137_v61 = vmov 1983009808  }
  0xc2   : > { %852 = vmatprep.subr.bf16.mxu1 %v851_v49  ;;  %v392_v9 = vunpack.c.l.s4 %v1137_v61 }
  0xc4   : > { %822 = vmatpush1.bf16.msra.mxu0 %v821_v51  ;;  %v393_v7 = vunpack.c.0.s8 %v392_v9 }
  0xc5   : > { %854 = vmatpush1.bf16.msra.mxu1 %v853_v4  ;;  %824 = vmatprep.subr.bf16.mxu0 %v823_v14 }
  0xc6   : > { %856 = vmatprep.subr.bf16.mxu1 %v855_v0  ;;  %v396_v59 = vsub.s32 %v393_v7, %v395_v12  ;;  %v242_v0 = vld [vmem:[%s241_s17] sm:$0xff] }
  0xc8   : > { %826 = vmatpush1.bf16.msra.mxu0 %v825_v8 }
  0xc9   : > { %858 = vmatpush1.bf16.msra.mxu1 %v857_v6 }
  0xcb   : > { %508 = vmatmul.mubr.f32.vlgmr.msra.gmra.mrb[2].mxu0 %v1880_v63 }
  0xcc   : > { %579 = vmatmul.mubr.f32.vlgmr.msra.gmra.mrb[2].mxu1 %v1880_v63 }
 0x17e   : > { %v309_v13 = vpop.f32.mrb[0].mxu0 }
 0x17f   : > { %v380_v49 = vpop.f32.mrb[0].mxu1  ;;  %v311_v5 = vpop.f32.mrb[1].mxu0 }
 0x180   : > { %v382_v51 = vpop.f32.mrb[1].mxu1  ;;  %v389_v57 = vcombine.low %v309_v13, %v311_v5 }
 0x181   : > { %v390_v2 = vcombine.low %v380_v49, %v382_v51 }
 0x182   : > { %v397_v4 = vrot.slane %v389_v57, %v396_v59 }
 0x183   : > { %v404_v14 = vrot.slane %v390_v2, %v396_v59 }
 0x185   : > { %v405_v3 = vcombine.low %v397_v4, %v404_v14 }
 0x187   : > { %v407_v8 = vadd.f32 %v405_v3, %v242_v0 }
 0x189   : > { %v719_v11 = vmul.f32 -1.442695, %v407_v8  ;;  %v415_v1 = vrot.slane %v407_v8, 2  ;;  %v426_v63 = vrot.slane %v407_v8, 6  ;;  %v423_v10 = vrot.slane %v407_v8, 4 }
 0x18b   : > { %913 = vpow2.f32 %v719_v11  ;;  %v720_v6 = vmul.f32 -1.442695, %v415_v1  ;;  %v721_v61 = vmul.f32 -1.442695, %v426_v63  ;;  %v442_v63 = vld [vmem:[%s441_s20] sm:$0xff] }
 0x18d   : > { %915 = vpow2.f32 %v720_v6 }
 0x18e   : > { %917 = vpow2.f32 %v721_v61  ;;  %v1881_v61 = vld [vmem:[#allocation108_spill] sm:$0xff] }
 0x195   : > { %v914_v9 = vpop.eup %913 }
 0x196   : > { %v411_v7 = vadd.f32 1.0, %v914_v9 }
 0x197   : > { %v916_v12 = vpop.eup %915 }
 0x198   : > { %919 = vrcp.f32 %v411_v7  ;;  %v420_v13 = vadd.f32 1.0, %v916_v12  ;;  %v918_v2 = vpop.eup %917 }
 0x199   : > { %921 = vtanh.f32 %v423_v10  ;;  %v431_v6 = vadd.f32 1.0, %v918_v2 }
 0x19a   : > { %923 = vrcp.f32 %v420_v13 }
 0x19b   : > { %925 = vrcp.f32 %v431_v6 }
 0x19e   : > { %v509_v49 = vpop.f32.mrb[2].mxu0 }
 0x19f   : > { %v580_v5 = vpop.f32.mrb[2].mxu1  ;;  %v511_v51 = vpop.f32.mrb[3].mxu0 }
 0x1a0   : > { %v582_v57 = vpop.f32.mrb[3].mxu1  ;;  %v589_v4 = vcombine.low %v509_v49, %v511_v51 }
 0x1a1   : > { %v590_v14 = vcombine.low %v580_v5, %v582_v57 }
 0x1a2   : > { %v920_v0 = vpop.eup %919  ;;  %v597_v8 = vrot.slane %v589_v4, %v396_v59 }
 0x1a3   : > { %v922_v3 = vpop.eup %921  ;;  %v604_v11 = vrot.slane %v590_v14, %v396_v59 }
 0x1a4   : > { %v924_v1 = vpop.eup %923  ;;  %v435_v10 = vmul.f32 %v922_v3, %v920_v0 }
 0x1a5   : > { %v434_v9 = vmul.f32 %v1881_v61, %v924_v1  ;;  %v605_v7 = vcombine.low %v597_v8, %v604_v11  ;;  %v926_v59 = vpop.eup %925  ;;  %v1882_v61 = vld [vmem:[#allocation106_spill] sm:$0xff] }
 0x1a7   : > { %v436_v12 = vadd.f32 %v435_v10, %v434_v9   ;;  %v607_v13 = vadd.f32 %v605_v7, %v442_v63 }
 0x1a9   : > { %927 = vtanh.f32 %v436_v12  ;;  %v724_v15 = vmul.f32 -1.442695, %v607_v13  ;;  %v615_v49 = vrot.slane %v607_v13, 2  ;;  %v626_v51 = vrot.slane %v607_v13, 6  ;;  %646 = vst [vmem:[#allocation2 + $0x2] sm:$0x3] (%p230_p4), %v436_v12 }
 0x1aa   : > { %v623_v16 = vrot.slane %v607_v13, 4 }
 0x1ab   : > { %929 = vpow2.f32 %v724_v15  ;;  %v725_v5 = vmul.f32 -1.442695, %v615_v49  ;;  %v726_v2 = vmul.f32 -1.442695, %v626_v51 }
 0x1ad   : > { %931 = vpow2.f32 %v725_v5 }
 0x1ae   : > { %933 = vpow2.f32 %v726_v2 }
 0x1b3   : > { %v928_v57 = vpop.eup %927 }
 0x1b4   : > { %v438_v4 = vmul.f32 %v928_v57, %v926_v59  }
 0x1b5   : > { %v930_v14 = vpop.eup %929 }
 0x1b6   : > { %641 = vst [vmem:[%s640_s23] sm:$0x3] %v438_v4  ;;  %v611_v0 = vadd.f32 1.0, %v930_v14  ;;  %645 = vst [vmem:[#allocation2] sm:$0x3] (%p230_p4), %v438_v4 }
 0x1b7   : > { %v932_v3 = vpop.eup %931 }
 0x1b8   : > { %935 = vrcp.f32 %v611_v0  ;;  %v620_v8 = vadd.f32 1.0, %v932_v3  ;;  %v934_v15 = vpop.eup %933  ;;  %v1885_v0 = vmov %v436_v12 }
 0x1b9   : > { %937 = vtanh.f32 %v623_v16  ;;  %v631_v63 = vadd.f32 1.0, %v934_v15 }
 0x1ba   : > { %939 = vrcp.f32 %v620_v8 }
 0x1bb   : > { %941 = vrcp.f32 %v631_v63  ;;  %v1886_v63 = vmov %v438_v4 }
 0x1c2   : > { %v936_v11 = vpop.eup %935 }
 0x1c3   : > { %v938_v1 = vpop.eup %937 }
 0x1c4   : > { %v940_v6 = vpop.eup %939  ;;  %v635_v10 = vmul.f32 %v938_v1, %v936_v11 }
 0x1c5   : > { %v634_v9 = vmul.f32 %v1882_v61, %v940_v6  ;;  %v942_v13 = vpop.eup %941 }
 0x1c7   : > { %v636_v7 = vadd.f32 %v635_v10, %v634_v9  }
 0x1c9   : > { %943 = vtanh.f32 %v636_v7  ;;  %v1883_v51 = vmov %v636_v7  ;;  %648 = vst [vmem:[#allocation2 + $0x6] sm:$0x3] (%p230_p4), %v636_v7 }
 0x1d0   :  { %232 = sbr.rel (!%p230_p4) target bundleno = 135 (0x87), region = 80 }
 0x1d3   : > { %v944_v49 = vpop.eup %943 }
 0x1d4   : > { %v638_v5 = vmul.f32 %v944_v49, %v942_v13  }
 0x1d6   : > { %644 = vst [vmem:[%s643_s25] sm:$0x3] %v638_v5  ;;  %v1884_v49 = vmov %v638_v5  ;;  %647 = vst [vmem:[#allocation2 + $0x4] sm:$0x3] (%p230_p4), %v638_v5 }
 0x1d7   :  { %1044 = shalt.err (!%p1041_p9)
}
 0x1d8   :  { %s1045_s7 = scalar_lea.hbm %s1697_s4, 256 }
 0x1d9   :  { %p1046_p10 = scmp.ne.s32.totalorder %s1697_s4, %s1045_s7  ;;  %p1049_p11 = scmp.lt.u32.totalorder %s1045_s7, %s1697_s4 }
 0x1db   :  { %p1051_p12 = pnand %p1049_p11, %p1046_p10 }
 0x1dd   :  { %1054 = shalt.err (!%p1051_p12)
}
 0x1de   :  { %s1140_s12 = smov 2   ;;  %s1055_s15 = scalar_lea.vmem %s671_s0, 256 }
 0x1df   :  { %660 = dma.vmem_to_hbm [thread:$0]  %s655_s27, 256, %s1697_s4, [#allocation5], %s1133_s21, %s1133_s21, %s1140_s12  }
 0x1e0   :  { %p1056_p13 = scmp.ne.s32.totalorder %s671_s0, %s1055_s15  ;;  %p1060_p0 = scmp.lt.s32.totalorder %s671_s0, %s671_s0 }
 0x1e1   :  { %p1061_p1 = scmp.lt.s32.totalorder %s1055_s15, %s1055_s15 }
 0x1e3   :  { %p1062_p2 = por %p1061_p1, %p1060_p0 }
 0x1e5   :  { %p1063_p3 = pnand %p1062_p2, %p1056_p13 }
 0x1e7   :  { %1066 = shalt.err (!%p1063_p3)
}
 0x1e8   :  { %s1067_s3 = scalar_lea.hbm %s1698_s5, 256 }
 0x1e9   :  { %p1068_p4 = scmp.ne.s32.totalorder %s1698_s5, %s1067_s3  ;;  %p1071_p5 = scmp.lt.u32.totalorder %s1067_s3, %s1698_s5 }
 0x1eb   :  { %p1073_p6 = pnand %p1071_p5, %p1068_p4 }
 0x1ed   :  { %1076 = shalt.err (!%p1073_p6)
}
 0x1ee   :  { %676 = dma.vmem_to_hbm [thread:$0]  %s671_s0, 256, %s1698_s5, [#allocation13], %s1133_s21, %s1133_s21, %s1140_s12  }
 0x1ef   :  { %1103 = dma.done.wait [#allocation5], 256  }
 0x1f0   :  { %1104 = vsyncadd [#allocation5], 4294967040 }
 0x1f1   :  { %1105 = dma.done.wait [#allocation13], 256  }
 0x1f2   :  { %1106 = vsyncadd [#allocation13], 4294967040 }
 0x1f3   :  { %683 = vsyncpa [#allocation4], 1 }
 0x1f4   :  { %684 = vsyncpa [#allocation7], 1 }
 0x1f5   :  { %685 = vsyncpa [#allocation10], 1 }
 0x1f6   :  { %686 = vsyncpa [#allocation5], 1 }
 0x1f7   :  { %687 = vsyncpa [#allocation13], 1 }

</bundles_post_ra>
